<compile_context>
chip_gen: v7x
topology: tpu7x:2x2x1
jax: 0.10.0
libtpu: 0.0.40
codegen_flags: <defaults>
</compile_context>

<pallas_src>
import jax
import jax.numpy as jnp
from jax.experimental import pallas as pl

HEAD_NUM = 2          # number of GAT heads
INPUT_SIZE = 32       # D  (== head_hid, required for shape consistency)
HEAD_HID = 32
N_NODES = 16          # N
N_EDGES = 8           # E
N_GRAPHS = 4          # B graphs packed into one kernel invocation
DROPOUT = 0.1         # eval mode -> identity
LEAKY_SLOPE = 0.01    # nn.LeakyReLU() default negative_slope

_HP = jax.lax.Precision.HIGHEST


def _l2norm(v, eps=1e-12):
    # F.normalize(v, p=2, dim=-1): v / max(||v||_2, eps)
    # == v * rsqrt(max(sum(v*v), eps^2))   (rsqrt goes to the EUP slot)
    ss = jnp.sum(v * v, axis=-1, keepdims=True)
    return v * jax.lax.rsqrt(jnp.maximum(ss, eps * eps))


def _leaky(v, slope=LEAKY_SLOPE):
    # LeakyReLU as a single vmax (valid because 0 < slope < 1).
    return jnp.maximum(v, slope * v)


def hyper_atten_kernel(x_ref, h_ref, whm_ref, bhm_ref, w1_ref, b1_ref,
                       w2_ref, b2_ref, o_ref):
    """Single-invocation kernel (no grid).

    x_ref   : [B, N, D]       node features (all graphs resident in VMEM)
    h_ref   : [B, E, N]       hyper-edge incidence matrices
    whm_ref : [B*D, B*D]      block-diagonal folded hm weight
    w1_ref, w2_ref : [B*D, B*D] block-diagonal ffn weights
    bhm_ref, b1_ref, b2_ref : [1, B*D] lane-tiled biases
    o_ref   : [N, B*D]        lane-packed output (graph b in lanes b*D:(b+1)*D)
    """
    B = x_ref.shape[0]
    f32 = jnp.float32

    # --- per-graph GAT stage (parameter-free): g_b = norm(H_b.T @ (H_b @ norm(x_b)))
    # Statically unrolled over B; H.T@H fold done in-kernel (no wrapper dispatch).
    g_parts, x_parts = [], []
    for b in range(B):
        xb = x_ref[b]                                               # [N, D]
        hb = h_ref[b]                                               # [E, N]
        xn = _l2norm(xb)
        e2h = jnp.dot(hb, xn, preferred_element_type=f32,
                      precision=_HP)                                # [E, D]
        # H_b.T @ e2h without an explicit transpose: contract the E axis.
        e2n = jax.lax.dot_general(hb, e2h, (((0,), (0,)), ((), ())),
                                  preferred_element_type=f32,
                                  precision=_HP)                    # [N, D]
        g_parts.append(_l2norm(e2n))
        x_parts.append(xb)

    # --- lane-pack the B graphs along the feature axis -> [N, B*D] = [16, 128]
    g = jnp.concatenate(g_parts, axis=-1)
    xp = jnp.concatenate(x_parts, axis=-1)

    # --- hm (identical heads folded into one matrix) + residual; one full-width
    #     MXU pass against the block-diagonal weight.
    hm = jnp.dot(g, whm_ref[...], preferred_element_type=f32,
                 precision=_HP) + bhm_ref[...]
    x1 = _leaky(hm) + xp

    # --- ffn: Linear -> LeakyReLU -> Linear -> LeakyReLU (+ Dropout identity)
    f = _leaky(jnp.dot(x1, w1_ref[...], preferred_element_type=f32,
                       precision=_HP) + b1_ref[...])
    f = _leaky(jnp.dot(f, w2_ref[...], preferred_element_type=f32,
                       precision=_HP) + b2_ref[...])

    # --- lane-dense (128-wide) unmasked store
    o_ref[...] = (f + x1).astype(o_ref.dtype)


def pack_params(whm, bhm, w1, b1, w2, b2, batch):
    """Per-(weights, batch) prep.  Call ONCE and reuse across dispatches.

    whm: [HEAD_NUM*D, D] (stored as [in, out] = W^T), bhm/b1/b2: [1, D],
    w1/w2: [D, D].  Returns block-diagonal weights + lane-tiled biases for the
    lane-packed [N, batch*D] layout.
    """
    D = whm.shape[1]
    assert whm.shape[0] == HEAD_NUM * D
    # Identical GAT heads -> fold the per-head slices of W_hm into one matrix.
    w_eff = whm[:D, :] + whm[D:, :]
    eye = jnp.eye(batch, dtype=whm.dtype)
    bd = lambda w: jnp.kron(eye, w)            # [batch*D, batch*D] block-diag
    tl = lambda bv: jnp.tile(bv, (1, batch))   # [1, batch*D]
    return (bd(w_eff), tl(bhm), bd(w1), tl(b1), bd(w2), tl(b2))


@jax.jit
def hyper_atten_block(x, H, packed):
    """Batched Hyper_Atten_Block forward (eval mode).

    x: [B, N, D] node features, H: [B, E, N] incidence,
    packed: output of pack_params(..., batch=B).  Returns [B, N, D].
    """
    B, N, D = x.shape
    assert HEAD_HID == INPUT_SIZE == D, "head_hid must equal input_size"
    whm_bd, bhm_t, w1_bd, b1_t, w2_bd, b2_t = packed

    out_packed = pl.pallas_call(
        hyper_atten_kernel,
        out_shape=jax.ShapeDtypeStruct((N, B * D), x.dtype),
    )(x, H, whm_bd, bhm_t, w1_bd, b1_t, w2_bd, b2_t)

    # [N, B*D] -> [B, N, D]  (layout plumbing only; lane-dense store in-kernel)
    return out_packed.reshape(N, B, D).transpose(1, 0, 2)


def reference(x, H, whm, bhm, w1, b1, w2, b2):
    # pure-JAX reference of the original (un-folded) forward, single graph
    g = _l2norm(jnp.dot(H.T, jnp.dot(H, _l2norm(x), precision=_HP),
                        precision=_HP))
    cat = jnp.concatenate([g] * HEAD_NUM, axis=-1)
    x1 = _leaky(jnp.dot(cat, whm, precision=_HP) + bhm) + x
    f = _leaky(jnp.dot(x1, w1, precision=_HP) + b1)
    f = _leaky(jnp.dot(f, w2, precision=_HP) + b2)
    return f + x1


if __name__ == "__main__":
    key = jax.random.PRNGKey(0)
    k = jax.random.split(key, 8)

    D, N, E, B = INPUT_SIZE, N_NODES, N_EDGES, N_GRAPHS

    x = jax.random.normal(k[0], (B, N, D), dtype=jnp.float32)
    # dense incidence matrices (edges x nodes), 0/1
    H = (jax.random.uniform(k[1], (B, E, N)) > 0.5).astype(jnp.float32)

    def lin_init(kk, fan_in, fan_out):
        bound = 1.0 / jnp.sqrt(jnp.float32(fan_in))
        kw, kb = jax.random.split(kk)
        w = jax.random.uniform(kw, (fan_in, fan_out), jnp.float32, -bound, bound)
        b = jax.random.uniform(kb, (1, fan_out), jnp.float32, -bound, bound)
        return w, b

    # hm: Linear(head_num*head_hid -> input_size)   (stored as [in, out] = W^T)
    whm, bhm = lin_init(k[2], HEAD_NUM * HEAD_HID, D)
    # ffn: Linear(D->D), Linear(D->D)
    w1, b1 = lin_init(k[3], D, D)
    w2, b2 = lin_init(k[4], D, D)

    # One-time weight packing (hoisted out of the dispatch path).
    packed = jax.block_until_ready(pack_params(whm, bhm, w1, b1, w2, b2, B))

    out = jax.block_until_ready(hyper_atten_block(x, H, packed))
    assert out.shape == (B, N, D)

    for b in range(B):
        ref = reference(x[b], H[b], whm, bhm, w1, b1, w2, b2)
        assert jnp.allclose(out[b], ref, rtol=1e-4, atol=1e-4), \
            f"mismatch vs reference on graph {b}"

    # also exercise the single-graph path (B = 1)
    packed1 = pack_params(whm, bhm, w1, b1, w2, b2, 1)
    out1 = jax.block_until_ready(hyper_atten_block(x[:1], H[:1], packed1))
    assert jnp.allclose(out1[0], out[0], rtol=1e-4, atol=1e-4)

    print("KERNEL_OK")
</pallas_src>

<mosaic_0001>
module attributes {stable_mosaic.version = 11 : i64} {
  func.func @hyper_atten_kernel(%arg0: memref<4x16x32xf32, #tpu.memory_space<vmem>>, %arg1: memref<4x8x16xf32, #tpu.memory_space<vmem>>, %arg2: memref<128x128xf32, #tpu.memory_space<vmem>>, %arg3: memref<1x128xf32, #tpu.memory_space<vmem>>, %arg4: memref<128x128xf32, #tpu.memory_space<vmem>>, %arg5: memref<1x128xf32, #tpu.memory_space<vmem>>, %arg6: memref<128x128xf32, #tpu.memory_space<vmem>>, %arg7: memref<1x128xf32, #tpu.memory_space<vmem>>, %arg8: memref<16x128xf32, #tpu.memory_space<vmem>>) attributes {dimension_semantics = [], scalar_prefetch = 0 : i64, scratch_operands = 0 : i64, tpu.core_type = #tpu.core_type<tc>} {
    %c0 = arith.constant 0 : index
    %c0_0 = arith.constant 0 : index
    %c0_1 = arith.constant 0 : index
    %0 = vector.load %arg0[%c0, %c0_0, %c0_1] : memref<4x16x32xf32, #tpu.memory_space<vmem>>, vector<1x16x32xf32>
    %1 = vector.shape_cast %0 : vector<1x16x32xf32> to vector<16x32xf32>
    %c0_2 = arith.constant 0 : index
    %c0_3 = arith.constant 0 : index
    %c0_4 = arith.constant 0 : index
    %2 = vector.load %arg1[%c0_2, %c0_3, %c0_4] : memref<4x8x16xf32, #tpu.memory_space<vmem>>, vector<1x8x16xf32>
    %3 = vector.shape_cast %2 : vector<1x8x16xf32> to vector<8x16xf32>
    %4 = arith.mulf %1, %1 : vector<16x32xf32>
    %cst = arith.constant dense<0.000000e+00> : vector<16xf32>
    %5 = vector.multi_reduction <add>, %4, %cst [1] : vector<16x32xf32> to vector<16xf32>
    %6 = vector.shape_cast %5 : vector<16xf32> to vector<16x1xf32>
    %cst_5 = arith.constant 1.000000e-24 : f32
    %7 = vector.broadcast %cst_5 : f32 to vector<16x1xf32>
    %8 = arith.maximumf %6, %7 : vector<16x1xf32>
    %9 = math.rsqrt %8 : vector<16x1xf32>
    %10 = vector.broadcast %9 : vector<16x1xf32> to vector<16x32xf32>
    %11 = arith.mulf %1, %10 : vector<16x32xf32>
    %cst_6 = arith.constant dense<0.000000e+00> : vector<8x32xf32>
    %12 = tpu.matmul %3, %11, %cst_6 {dimension_numbers = #tpu.dot_dimension_numbers<[1], [0], [0], [1], [0, 0, 1, 1], [], []>, precision = #tpu.contract_precision<fp32>} : vector<8x16xf32>, vector<16x32xf32>, vector<8x32xf32> -> vector<8x32xf32>
    %cst_7 = arith.constant dense<0.000000e+00> : vector<16x32xf32>
    %13 = tpu.matmul %3, %12, %cst_7 {dimension_numbers = #tpu.dot_dimension_numbers<[0], [0], [1], [1], [0, 1, 1, 1], [], []>, precision = #tpu.contract_precision<fp32>} : vector<8x16xf32>, vector<8x32xf32>, vector<16x32xf32> -> vector<16x32xf32>
    %14 = arith.mulf %13, %13 : vector<16x32xf32>
    %cst_8 = arith.constant dense<0.000000e+00> : vector<16xf32>
    %15 = vector.multi_reduction <add>, %14, %cst_8 [1] : vector<16x32xf32> to vector<16xf32>
    %16 = vector.shape_cast %15 : vector<16xf32> to vector<16x1xf32>
    %cst_9 = arith.constant 1.000000e-24 : f32
    %17 = vector.broadcast %cst_9 : f32 to vector<16x1xf32>
    %18 = arith.maximumf %16, %17 : vector<16x1xf32>
    %19 = math.rsqrt %18 : vector<16x1xf32>
    %20 = vector.broadcast %19 : vector<16x1xf32> to vector<16x32xf32>
    %21 = arith.mulf %13, %20 : vector<16x32xf32>
    %c1 = arith.constant 1 : index
    %c0_10 = arith.constant 0 : index
    %c0_11 = arith.constant 0 : index
    %22 = vector.load %arg0[%c1, %c0_10, %c0_11] : memref<4x16x32xf32, #tpu.memory_space<vmem>>, vector<1x16x32xf32>
    %23 = vector.shape_cast %22 : vector<1x16x32xf32> to vector<16x32xf32>
    %c1_12 = arith.constant 1 : index
    %c0_13 = arith.constant 0 : index
    %c0_14 = arith.constant 0 : index
    %24 = vector.load %arg1[%c1_12, %c0_13, %c0_14] : memref<4x8x16xf32, #tpu.memory_space<vmem>>, vector<1x8x16xf32>
    %25 = vector.shape_cast %24 : vector<1x8x16xf32> to vector<8x16xf32>
    %26 = arith.mulf %23, %23 : vector<16x32xf32>
    %cst_15 = arith.constant dense<0.000000e+00> : vector<16xf32>
    %27 = vector.multi_reduction <add>, %26, %cst_15 [1] : vector<16x32xf32> to vector<16xf32>
    %28 = vector.shape_cast %27 : vector<16xf32> to vector<16x1xf32>
    %cst_16 = arith.constant 1.000000e-24 : f32
    %29 = vector.broadcast %cst_16 : f32 to vector<16x1xf32>
    %30 = arith.maximumf %28, %29 : vector<16x1xf32>
    %31 = math.rsqrt %30 : vector<16x1xf32>
    %32 = vector.broadcast %31 : vector<16x1xf32> to vector<16x32xf32>
    %33 = arith.mulf %23, %32 : vector<16x32xf32>
    %cst_17 = arith.constant dense<0.000000e+00> : vector<8x32xf32>
    %34 = tpu.matmul %25, %33, %cst_17 {dimension_numbers = #tpu.dot_dimension_numbers<[1], [0], [0], [1], [0, 0, 1, 1], [], []>, precision = #tpu.contract_precision<fp32>} : vector<8x16xf32>, vector<16x32xf32>, vector<8x32xf32> -> vector<8x32xf32>
    %cst_18 = arith.constant dense<0.000000e+00> : vector<16x32xf32>
    %35 = tpu.matmul %25, %34, %cst_18 {dimension_numbers = #tpu.dot_dimension_numbers<[0], [0], [1], [1], [0, 1, 1, 1], [], []>, precision = #tpu.contract_precision<fp32>} : vector<8x16xf32>, vector<8x32xf32>, vector<16x32xf32> -> vector<16x32xf32>
    %36 = arith.mulf %35, %35 : vector<16x32xf32>
    %cst_19 = arith.constant dense<0.000000e+00> : vector<16xf32>
    %37 = vector.multi_reduction <add>, %36, %cst_19 [1] : vector<16x32xf32> to vector<16xf32>
    %38 = vector.shape_cast %37 : vector<16xf32> to vector<16x1xf32>
    %cst_20 = arith.constant 1.000000e-24 : f32
    %39 = vector.broadcast %cst_20 : f32 to vector<16x1xf32>
    %40 = arith.maximumf %38, %39 : vector<16x1xf32>
    %41 = math.rsqrt %40 : vector<16x1xf32>
    %42 = vector.broadcast %41 : vector<16x1xf32> to vector<16x32xf32>
    %43 = arith.mulf %35, %42 : vector<16x32xf32>
    %c2 = arith.constant 2 : index
    %c0_21 = arith.constant 0 : index
    %c0_22 = arith.constant 0 : index
    %44 = vector.load %arg0[%c2, %c0_21, %c0_22] : memref<4x16x32xf32, #tpu.memory_space<vmem>>, vector<1x16x32xf32>
    %45 = vector.shape_cast %44 : vector<1x16x32xf32> to vector<16x32xf32>
    %c2_23 = arith.constant 2 : index
    %c0_24 = arith.constant 0 : index
    %c0_25 = arith.constant 0 : index
    %46 = vector.load %arg1[%c2_23, %c0_24, %c0_25] : memref<4x8x16xf32, #tpu.memory_space<vmem>>, vector<1x8x16xf32>
    %47 = vector.shape_cast %46 : vector<1x8x16xf32> to vector<8x16xf32>
    %48 = arith.mulf %45, %45 : vector<16x32xf32>
    %cst_26 = arith.constant dense<0.000000e+00> : vector<16xf32>
    %49 = vector.multi_reduction <add>, %48, %cst_26 [1] : vector<16x32xf32> to vector<16xf32>
    %50 = vector.shape_cast %49 : vector<16xf32> to vector<16x1xf32>
    %cst_27 = arith.constant 1.000000e-24 : f32
    %51 = vector.broadcast %cst_27 : f32 to vector<16x1xf32>
    %52 = arith.maximumf %50, %51 : vector<16x1xf32>
    %53 = math.rsqrt %52 : vector<16x1xf32>
    %54 = vector.broadcast %53 : vector<16x1xf32> to vector<16x32xf32>
    %55 = arith.mulf %45, %54 : vector<16x32xf32>
    %cst_28 = arith.constant dense<0.000000e+00> : vector<8x32xf32>
    %56 = tpu.matmul %47, %55, %cst_28 {dimension_numbers = #tpu.dot_dimension_numbers<[1], [0], [0], [1], [0, 0, 1, 1], [], []>, precision = #tpu.contract_precision<fp32>} : vector<8x16xf32>, vector<16x32xf32>, vector<8x32xf32> -> vector<8x32xf32>
    %cst_29 = arith.constant dense<0.000000e+00> : vector<16x32xf32>
    %57 = tpu.matmul %47, %56, %cst_29 {dimension_numbers = #tpu.dot_dimension_numbers<[0], [0], [1], [1], [0, 1, 1, 1], [], []>, precision = #tpu.contract_precision<fp32>} : vector<8x16xf32>, vector<8x32xf32>, vector<16x32xf32> -> vector<16x32xf32>
    %58 = arith.mulf %57, %57 : vector<16x32xf32>
    %cst_30 = arith.constant dense<0.000000e+00> : vector<16xf32>
    %59 = vector.multi_reduction <add>, %58, %cst_30 [1] : vector<16x32xf32> to vector<16xf32>
    %60 = vector.shape_cast %59 : vector<16xf32> to vector<16x1xf32>
    %cst_31 = arith.constant 1.000000e-24 : f32
    %61 = vector.broadcast %cst_31 : f32 to vector<16x1xf32>
    %62 = arith.maximumf %60, %61 : vector<16x1xf32>
    %63 = math.rsqrt %62 : vector<16x1xf32>
    %64 = vector.broadcast %63 : vector<16x1xf32> to vector<16x32xf32>
    %65 = arith.mulf %57, %64 : vector<16x32xf32>
    %c3 = arith.constant 3 : index
    %c0_32 = arith.constant 0 : index
    %c0_33 = arith.constant 0 : index
    %66 = vector.load %arg0[%c3, %c0_32, %c0_33] : memref<4x16x32xf32, #tpu.memory_space<vmem>>, vector<1x16x32xf32>
    %67 = vector.shape_cast %66 : vector<1x16x32xf32> to vector<16x32xf32>
    %c3_34 = arith.constant 3 : index
    %c0_35 = arith.constant 0 : index
    %c0_36 = arith.constant 0 : index
    %68 = vector.load %arg1[%c3_34, %c0_35, %c0_36] : memref<4x8x16xf32, #tpu.memory_space<vmem>>, vector<1x8x16xf32>
    %69 = vector.shape_cast %68 : vector<1x8x16xf32> to vector<8x16xf32>
    %70 = arith.mulf %67, %67 : vector<16x32xf32>
    %cst_37 = arith.constant dense<0.000000e+00> : vector<16xf32>
    %71 = vector.multi_reduction <add>, %70, %cst_37 [1] : vector<16x32xf32> to vector<16xf32>
    %72 = vector.shape_cast %71 : vector<16xf32> to vector<16x1xf32>
    %cst_38 = arith.constant 1.000000e-24 : f32
    %73 = vector.broadcast %cst_38 : f32 to vector<16x1xf32>
    %74 = arith.maximumf %72, %73 : vector<16x1xf32>
    %75 = math.rsqrt %74 : vector<16x1xf32>
    %76 = vector.broadcast %75 : vector<16x1xf32> to vector<16x32xf32>
    %77 = arith.mulf %67, %76 : vector<16x32xf32>
    %cst_39 = arith.constant dense<0.000000e+00> : vector<8x32xf32>
    %78 = tpu.matmul %69, %77, %cst_39 {dimension_numbers = #tpu.dot_dimension_numbers<[1], [0], [0], [1], [0, 0, 1, 1], [], []>, precision = #tpu.contract_precision<fp32>} : vector<8x16xf32>, vector<16x32xf32>, vector<8x32xf32> -> vector<8x32xf32>
    %cst_40 = arith.constant dense<0.000000e+00> : vector<16x32xf32>
    %79 = tpu.matmul %69, %78, %cst_40 {dimension_numbers = #tpu.dot_dimension_numbers<[0], [0], [1], [1], [0, 1, 1, 1], [], []>, precision = #tpu.contract_precision<fp32>} : vector<8x16xf32>, vector<8x32xf32>, vector<16x32xf32> -> vector<16x32xf32>
    %80 = arith.mulf %79, %79 : vector<16x32xf32>
    %cst_41 = arith.constant dense<0.000000e+00> : vector<16xf32>
    %81 = vector.multi_reduction <add>, %80, %cst_41 [1] : vector<16x32xf32> to vector<16xf32>
    %82 = vector.shape_cast %81 : vector<16xf32> to vector<16x1xf32>
    %cst_42 = arith.constant 1.000000e-24 : f32
    %83 = vector.broadcast %cst_42 : f32 to vector<16x1xf32>
    %84 = arith.maximumf %82, %83 : vector<16x1xf32>
    %85 = math.rsqrt %84 : vector<16x1xf32>
    %86 = vector.broadcast %85 : vector<16x1xf32> to vector<16x32xf32>
    %87 = arith.mulf %79, %86 : vector<16x32xf32>
    %88 = tpu.concatenate %21, %43, %65, %87 in 1 : vector<16x32xf32>, vector<16x32xf32>, vector<16x32xf32>, vector<16x32xf32> -> vector<16x128xf32>
    %89 = tpu.concatenate %1, %23, %45, %67 in 1 : vector<16x32xf32>, vector<16x32xf32>, vector<16x32xf32>, vector<16x32xf32> -> vector<16x128xf32>
    %c0_43 = arith.constant 0 : index
    %c0_44 = arith.constant 0 : index
    %90 = vector.load %arg2[%c0_43, %c0_44] : memref<128x128xf32, #tpu.memory_space<vmem>>, vector<128x128xf32>
    %cst_45 = arith.constant dense<0.000000e+00> : vector<16x128xf32>
    %91 = tpu.matmul %88, %90, %cst_45 {dimension_numbers = #tpu.dot_dimension_numbers<[1], [0], [0], [1], [0, 0, 1, 1], [], []>, precision = #tpu.contract_precision<fp32>} : vector<16x128xf32>, vector<128x128xf32>, vector<16x128xf32> -> vector<16x128xf32>
    %c0_46 = arith.constant 0 : index
    %c0_47 = arith.constant 0 : index
    %92 = vector.load %arg3[%c0_46, %c0_47] : memref<1x128xf32, #tpu.memory_space<vmem>>, vector<1x128xf32>
    %93 = vector.broadcast %92 : vector<1x128xf32> to vector<16x128xf32>
    %94 = arith.addf %91, %93 : vector<16x128xf32>
    %cst_48 = arith.constant 0.00999999977 : f32
    %95 = vector.broadcast %cst_48 : f32 to vector<16x128xf32>
    %96 = arith.mulf %95, %94 : vector<16x128xf32>
    %97 = arith.maximumf %94, %96 : vector<16x128xf32>
    %98 = arith.addf %97, %89 : vector<16x128xf32>
    %c0_49 = arith.constant 0 : index
    %c0_50 = arith.constant 0 : index
    %99 = vector.load %arg4[%c0_49, %c0_50] : memref<128x128xf32, #tpu.memory_space<vmem>>, vector<128x128xf32>
    %cst_51 = arith.constant dense<0.000000e+00> : vector<16x128xf32>
    %100 = tpu.matmul %98, %99, %cst_51 {dimension_numbers = #tpu.dot_dimension_numbers<[1], [0], [0], [1], [0, 0, 1, 1], [], []>, precision = #tpu.contract_precision<fp32>} : vector<16x128xf32>, vector<128x128xf32>, vector<16x128xf32> -> vector<16x128xf32>
    %c0_52 = arith.constant 0 : index
    %c0_53 = arith.constant 0 : index
    %101 = vector.load %arg5[%c0_52, %c0_53] : memref<1x128xf32, #tpu.memory_space<vmem>>, vector<1x128xf32>
    %102 = vector.broadcast %101 : vector<1x128xf32> to vector<16x128xf32>
    %103 = arith.addf %100, %102 : vector<16x128xf32>
    %cst_54 = arith.constant 0.00999999977 : f32
    %104 = vector.broadcast %cst_54 : f32 to vector<16x128xf32>
    %105 = arith.mulf %104, %103 : vector<16x128xf32>
    %106 = arith.maximumf %103, %105 : vector<16x128xf32>
    %c0_55 = arith.constant 0 : index
    %c0_56 = arith.constant 0 : index
    %107 = vector.load %arg6[%c0_55, %c0_56] : memref<128x128xf32, #tpu.memory_space<vmem>>, vector<128x128xf32>
    %cst_57 = arith.constant dense<0.000000e+00> : vector<16x128xf32>
    %108 = tpu.matmul %106, %107, %cst_57 {dimension_numbers = #tpu.dot_dimension_numbers<[1], [0], [0], [1], [0, 0, 1, 1], [], []>, precision = #tpu.contract_precision<fp32>} : vector<16x128xf32>, vector<128x128xf32>, vector<16x128xf32> -> vector<16x128xf32>
    %c0_58 = arith.constant 0 : index
    %c0_59 = arith.constant 0 : index
    %109 = vector.load %arg7[%c0_58, %c0_59] : memref<1x128xf32, #tpu.memory_space<vmem>>, vector<1x128xf32>
    %110 = vector.broadcast %109 : vector<1x128xf32> to vector<16x128xf32>
    %111 = arith.addf %108, %110 : vector<16x128xf32>
    %cst_60 = arith.constant 0.00999999977 : f32
    %112 = vector.broadcast %cst_60 : f32 to vector<16x128xf32>
    %113 = arith.mulf %112, %111 : vector<16x128xf32>
    %114 = arith.maximumf %111, %113 : vector<16x128xf32>
    %115 = arith.addf %114, %98 : vector<16x128xf32>
    %c0_61 = arith.constant 0 : index
    %c0_62 = arith.constant 0 : index
    %116 = vector.load %arg8[%c0_61, %c0_62] : memref<16x128xf32, #tpu.memory_space<vmem>>, vector<16x128xf32>
    tpu.vector_store %arg8[%c0_61, %c0_62], %115 {strides = array<i32>} : memref<16x128xf32, #tpu.memory_space<vmem>>, vector<16x128xf32>,
    return
  }
}

</mosaic_0001>

<bundles_post_ra>
// kernel: hyper_atten_block.1
= control target key start
LH: loop header
LB: loop body
LE: loop exit
PB: predicated region body
PF: predicated region fallthrough
CT: control target
= control target key end

     0   :  { %13 = vsyncpa [#allocation3], 0  ;;  %s10086_s0 = inlined_call_operand.hbm [shape: f32[4,16,32], index: 0, kind: input, shape index: {}]   ;;  %s10087_s1 = inlined_call_operand.hbm [shape: f32[4,8,16], index: 1, kind: input, shape index: {}]   ;;  %s10088_s2 = inlined_call_operand.hbm [shape: f32[128,128], index: 2, kind: input, shape index: {}]   ;;  %s10089_s3 = inlined_call_operand.vmem [shape: f32[1,128], index: 3, kind: input, shape index: {}]   ;;  %s10090_s4 = inlined_call_operand.hbm [shape: f32[128,128], index: 4, kind: input, shape index: {}]   ;;  %s10091_s5 = inlined_call_operand.vmem [shape: f32[1,128], index: 5, kind: input, shape index: {}]   ;;  %s10092_s6 = inlined_call_operand.hbm [shape: f32[128,128], index: 6, kind: input, shape index: {}]   ;;  %s10093_s7 = inlined_call_operand.vmem [shape: f32[1,128], index: 7, kind: input, shape index: {}]   ;;  %s10094_s8 = inlined_call_operand.vmem [shape: f32[16,128], index: 8, kind: output, shape index: {}]  }
   0x1   :  { %14 = vsyncpa [#allocation5], 0 }
   0x2   :  { %15 = vsyncpa [#allocation8], 0  ;;  %s8716_s27 = smov [#allocation4]   ;;  %s8717_s29 = smov [#allocation7]  }
   0x3   :  { %s33_s28 = sshll.u32 %s8716_s27, 4  ;;  %s59_s30 = sshll.u32 %s8717_s29, 4  ;;  %s34_s28 = int_to_ptr.vmem [resolvable:$true] %s33_s28  ;;  %s8774_s30 = int_to_ptr.vmem [resolvable:$true] %s59_s30 }
   0x4   :  { %s8600_s11 = scalar_lea.hbm %s10087_s1, 512 }
   0x5   :  { %p8601_p0 = scmp.ne.s32.totalorder %s10087_s1, %s8600_s11  ;;  %p8604_p1 = scmp.lt.u32.totalorder %s8600_s11, %s10087_s1 }
   0x7   :  { %p8606_p2 = pnand %p8604_p1, %p8601_p0 }
   0x9   :  { %8609 = shalt.err (!%p8606_p2)
}
   0xa   :  { %s8610_s16 = scalar_lea.vmem %s34_s28, 512  ;;  %p8615_p4 = scmp.lt.s32.totalorder %s34_s28, %s34_s28 }
   0xb   :  { %p8611_p3 = scmp.ne.s32.totalorder %s34_s28, %s8610_s16  ;;  %p8616_p5 = scmp.lt.s32.totalorder %s8610_s16, %s8610_s16 }
   0xd   :  { %p8617_p6 = por %p8616_p5, %p8615_p4 }
   0xf   :  { %p8618_p7 = pnand %p8617_p6, %p8611_p3 }
  0x11   :  { %8621 = shalt.err (!%p8618_p7)
}
  0x12   :  { %s8718_s17 = smov 128   ;;  %s8719_s18 = smov 8  }
  0x13   :  { %39 = dma.hbm_to_vmem [thread:$0]  %s10087_s1, 512, %s34_s28, [#allocation5], %s8718_s17, %s8718_s17, %s8719_s18  }
  0x14   :  { %s8622_s23 = scalar_lea.hbm %s10090_s4, 2048 }
  0x15   :  { %p8623_p8 = scmp.ne.s32.totalorder %s10090_s4, %s8622_s23  ;;  %p8626_p9 = scmp.lt.u32.totalorder %s8622_s23, %s10090_s4 }
  0x17   :  { %p8628_p10 = pnand %p8626_p9, %p8623_p8 }
  0x19   :  { %8631 = shalt.err (!%p8628_p10)
}
  0x1a   :  { %s8632_s29 = scalar_lea.vmem %s8774_s30, 2048  ;;  %p8637_p12 = scmp.lt.s32.totalorder %s8774_s30, %s8774_s30 }
  0x1b   :  { %p8633_p11 = scmp.ne.s32.totalorder %s8774_s30, %s8632_s29  ;;  %p8638_p13 = scmp.lt.s32.totalorder %s8632_s29, %s8632_s29 }
  0x1d   :  { %p8639_p0 = por %p8638_p13, %p8637_p12 }
  0x1f   :  { %p8640_p1 = pnand %p8639_p0, %p8633_p11 }
  0x21   :  { %8643 = shalt.err (!%p8640_p1)
}
  0x22   :  { %65 = dma.hbm_to_vmem [thread:$0]  %s10090_s4, 2048, %s8774_s30, [#allocation8], %s8718_s17, %s8718_s17, %s8719_s18  }
  0x23   :  { %s8720_s9 = smov [#allocation2]   ;;  %s8721_s11 = smov [#allocation6]  }
  0x24   :  { %s21_s10 = sshll.u32 %s8720_s9, 4  ;;  %s45_s12 = sshll.u32 %s8721_s11, 4  ;;  %s22_s10 = int_to_ptr.vmem [resolvable:$true] %s21_s10  ;;  %s8811_s12 = int_to_ptr.vmem [resolvable:$true] %s45_s12 }
  0x25   :  { %s8644_s15 = scalar_lea.hbm %s10086_s0, 1024 }
  0x26   :  { %p8645_p2 = scmp.ne.s32.totalorder %s10086_s0, %s8644_s15  ;;  %p8648_p3 = scmp.lt.u32.totalorder %s8644_s15, %s10086_s0 }
  0x28   :  { %p8650_p4 = pnand %p8648_p3, %p8645_p2 }
  0x2a   :  { %8653 = shalt.err (!%p8650_p4)
}
  0x2b   :  { %s8654_s4 = scalar_lea.vmem %s22_s10, 1024  ;;  %p8659_p6 = scmp.lt.s32.totalorder %s22_s10, %s22_s10 }
  0x2c   :  { %p8655_p5 = scmp.ne.s32.totalorder %s22_s10, %s8654_s4  ;;  %p8660_p7 = scmp.lt.s32.totalorder %s8654_s4, %s8654_s4 }
  0x2e   :  { %p8661_p8 = por %p8660_p7, %p8659_p6 }
  0x30   :  { %p8662_p9 = pnand %p8661_p8, %p8655_p5 }
  0x32   :  { %8665 = shalt.err (!%p8662_p9)
}
  0x33   :  { %27 = dma.hbm_to_vmem [thread:$0]  %s10086_s0, 1024, %s22_s10, [#allocation3], %s8718_s17, %s8718_s17, %s8719_s18  }
  0x34   :  { %s8666_s25 = scalar_lea.hbm %s10088_s2, 2048 }
  0x35   :  { %p8667_p10 = scmp.ne.s32.totalorder %s10088_s2, %s8666_s25  ;;  %p8670_p11 = scmp.lt.u32.totalorder %s8666_s25, %s10088_s2 }
  0x37   :  { %p8672_p12 = pnand %p8670_p11, %p8667_p10 }
  0x39   :  { %8675 = shalt.err (!%p8672_p12)
}
  0x3a   :  { %s8676_s28 = scalar_lea.vmem %s8811_s12, 2048  ;;  %p8681_p0 = scmp.lt.s32.totalorder %s8811_s12, %s8811_s12 }
  0x3b   :  { %p8677_p13 = scmp.ne.s32.totalorder %s8811_s12, %s8676_s28  ;;  %p8682_p1 = scmp.lt.s32.totalorder %s8676_s28, %s8676_s28 }
  0x3d   :  { %p8683_p2 = por %p8682_p1, %p8681_p0 }
  0x3f   :  { %p8684_p3 = pnand %p8683_p2, %p8677_p13 }
  0x41   :  { %8687 = shalt.err (!%p8684_p3)
}
  0x42   :  { %51 = dma.hbm_to_vmem [thread:$0]  %s10088_s2, 2048, %s8811_s12, [#allocation5], %s8718_s17, %s8718_s17, %s8719_s18  }
  0x43   :  { %s8722_s10 = smov [#allocation9]   ;;  %s8688_s15 = scalar_lea.hbm %s10092_s6, 2048 }
  0x44   :  { %s73_s11 = sshll.u32 %s8722_s10, 4  ;;  %p8689_p4 = scmp.ne.s32.totalorder %s10092_s6, %s8688_s15  ;;  %s74_s11 = int_to_ptr.vmem [resolvable:$true] %s73_s11 }
  0x45   :  { %p8692_p5 = scmp.lt.u32.totalorder %s8688_s15, %s10092_s6 }
  0x47   :  { %p8694_p6 = pnand %p8692_p5, %p8689_p4 }
  0x49   :  { %8697 = shalt.err (!%p8694_p6)
}
  0x4a   :  { %s8698_s4 = scalar_lea.vmem %s74_s11, 2048  ;;  %p8703_p8 = scmp.lt.s32.totalorder %s74_s11, %s74_s11 }
  0x4b   :  { %p8699_p7 = scmp.ne.s32.totalorder %s74_s11, %s8698_s4  ;;  %p8704_p9 = scmp.lt.s32.totalorder %s8698_s4, %s8698_s4 }
  0x4d   :  { %p8705_p10 = por %p8704_p9, %p8703_p8 }
  0x4f   :  { %p8706_p11 = pnand %p8705_p10, %p8699_p7 }
  0x51   :  { %8709 = shalt.err (!%p8706_p11)
}
  0x52   :  { %79 = dma.hbm_to_vmem [thread:$0]  %s10092_s6, 2048, %s74_s11, [#allocation8], %s8718_s17, %s8718_s17, %s8719_s18  }
  0x53   :  { %8710 = dma.done.wait [#allocation3], 1024  }
  0x54   :  { %8711 = vsyncadd [#allocation3], 4294966272 }
  0x55   :  { %8712 = dma.done.wait [#allocation5], 2560  }
  0x56   :  { %8713 = vsyncadd [#allocation5], 4294964736 }
  0x57   :  { %8714 = dma.done.wait [#allocation8], 4096  }
  0x58   :  { %8715 = vsyncadd [#allocation8], 4294963200  ;;  %v97_v0 = vld [vmem:[#allocation2] sm:$0xff]  ;;  %vm102_vm0 = vcmask 261120   ;;  %v98_v1 = vld [vmem:[#allocation2 + $0x8] sm:$0xff]  ;;  %v8723_v6 = vmov 0.0|0.0  }
  0x59   :  { %v100_v2 = vmul.f32 %v97_v0, %v97_v0  ;;  %v101_v3 = vmul.f32 %v98_v1, %v98_v1  ;;  %7783 = vmatprep.subr.bf16.mxu0 %v8723_v6  ;;  %vm8724_vm1 = vmmov 0   ;;  %v8725_v7 = vmov 0.0   ;;  %v99_v8 = vld [vmem:[#allocation4] sm:$0xff]  ;;  %v8868_v9 = vld [vmem:[#allocation2 + $0x10] sm:$0xff]  ;;  %v8870_v10 = vld [vmem:[#allocation2 + $0x18] sm:$0xff]  ;;  %s8726_s6 = smov 32  }
  0x5a   :  { %6869 = vmatprep.mubr.msk.f32.mxu0 %vm8724_vm1, %v8725_v7  ;;  %v1125_v11 = vmul.f32 %v8868_v9, %v8868_v9  ;;  %v1126_v12 = vmul.f32 %v8870_v10, %v8870_v10  ;;  %v8876_v13 = vld [vmem:[#allocation2 + $0x20] sm:$0xff]  ;;  %v8882_v17 = vld [vmem:[#allocation2 + $0x28] sm:$0xff]  ;;  %v8887_v20 = vld [vmem:[#allocation2 + $0x30] sm:$0xff]  ;;  %vm115_vm2 = vcmask 130048   ;;  %vm610_vm3 = vcmask 64512   ;;  %s8727_s17 = smov 64  }
  0x5b   :  { %v103_v4 = vsel %vm102_vm0, %v100_v2, 0.0  ;;  %v106_v5 = vsel %vm102_vm0, %v101_v3, 0.0  ;;  %v2147_v16 = vmul.f32 %v8876_v13, %v8876_v13  ;;  %v2148_v19 = vmul.f32 %v8882_v17, %v8882_v17  ;;  %v8892_v23 = vld [vmem:[#allocation2 + $0x38] sm:$0xff]  ;;  %v1124_v62 = vld [vmem:[#allocation4 + $0x8] sm:$0xff]  ;;  %v8918_v63 = vld [vmem:[#allocation4 + $0x10] sm:$0xff]  ;;  %s8728_s18 = smov 96  }
  0x5c   :  { %104 = vadd.xlane.f32.xlu0 %v103_v4  ;;  %v1127_v14 = vsel %vm102_vm0, %v1125_v11, 0.0  ;;  %v1130_v15 = vsel %vm102_vm0, %v1126_v12, 0.0  ;;  %v3169_v22 = vmul.f32 %v8887_v20, %v8887_v20  ;;  %v3170_v25 = vmul.f32 %v8892_v23, %v8892_v23 }
  0x5d   :  { %1128 = vadd.xlane.f32.xlu1 %v1127_v14  ;;  %v2149_v18 = vsel %vm102_vm0, %v2147_v16, 0.0  ;;  %v2152_v21 = vsel %vm102_vm0, %v2148_v19, 0.0  ;;  %v117_v30 = vsel %vm115_vm2, %v99_v8, 0  ;;  %vm4212_vm4 = vcmask 523264  }
  0x5e   :  { %v3171_v24 = vsel %vm102_vm0, %v3169_v22, 0.0  ;;  %v3174_v26 = vsel %vm102_vm0, %v3170_v25, 0.0  ;;  %v186_v32 = vand.u32 4294901760, %v117_v30  ;;  %vm4215_vm5 = vcmask 785408  }
  0x60   :  { %107 = vadd.xlane.f32.xlu0 %v106_v5  ;;  %v187_v33 = vsub.f32 %v117_v30, %v186_v32 }
  0x61   :  { %1131 = vadd.xlane.f32.xlu1 %v1130_v15 }
  0x62   :  { %v188_v36 = vand.u32 4294901760, %v187_v33 }
  0x64   :  { %v189_v41 = vsub.f32 %v187_v33, %v188_v36 }
  0x65   :  { %2150 = vadd.xlane.f32.xlu1 %v2149_v18 }
  0x66   :  { %v190_v46 = vand.u32 4294901760, %v189_v41 }
  0x69   :  { %2153 = vadd.xlane.f32.xlu1 %v2152_v21 }
  0x6d   :  { %3172 = vadd.xlane.f32.xlu1 %v3171_v24 }
  0x71   :  { %3175 = vadd.xlane.f32.xlu1 %v3174_v26 }
  0x8d   :  { %578 = vxpose.xlu0.b32.start.end [1/1] (short) (narrow) %v99_v8, 16  ;;  %v8925_v8 = vld [vmem:[#allocation4 + $0x18] sm:$0xff] }
  0x92   :  { %2623 = vxpose.xlu0.b32.start.end [1/1] (short) (narrow) %v8918_v63, 16 }
  0x97   :  { %3645 = vxpose.xlu0.b32.start.end [1/1] (short) (narrow) %v8925_v8, 16 }
  0xa4   :  { %1601 = vxpose.xlu1.b32.start.end [1/1] (short) (narrow) %v1124_v62, 16 }
  0xe9   :  { %v105_v27 = vpop.xlane.xlu0 %104 }
  0xea   :  { %v109_v28 = vmax.f32 %v105_v27, 1e-24  ;;  %v1129_v5 = vpop.xlane.xlu1 %1128 }
  0xeb   :  { %v1133_v22 = vmax.f32 %v1129_v5, 1e-24 }
  0xec   :  { %8560 = vrsqrt.f32 %v109_v28 }
  0xed   :  { %v108_v29 = vpop.xlane.xlu0 %107 }
  0xee   :  { %v110_v31 = vmax.f32 %v108_v29, 1e-24  ;;  %v1132_v19 = vpop.xlane.xlu1 %1131 }
  0xef   :  { %v1134_v25 = vmax.f32 %v1132_v19, 1e-24 }
  0xf0   :  { %8562 = vrsqrt.f32 %v110_v31  ;;  %v1140_v31 = vsel %vm115_vm2, %v1124_v62, 0 }
  0xf1   :  { %8564 = vrsqrt.f32 %v1133_v22 }
  0xf2   :  { %8566 = vrsqrt.f32 %v1134_v25 }
  0xf6   :  { %v8561_v34 = vpop.eup %8560 }
  0xf7   :  { %v113_v35 = vmul.f32 %v8561_v34, %v97_v0  ;;  %v8933_v34 = vand.u32 4294901760, %v1140_v31 }
  0xf9   :  { %v120_v37 = vand.u32 4294901760, %v113_v35 }
  0xfa   :  { %v8563_v38 = vpop.eup %8562 }
  0xfb   :  { %v114_v39 = vmul.f32 %v8563_v38, %v98_v1  ;;  %v198_v40 = vsub.f32 %v113_v35, %v120_v37  ;;  %v8565_v27 = vpop.eup %8564 }
  0xfc   :  { %v8567_v28 = vpop.eup %8566  ;;  %v1137_v29 = vmul.f32 %v8565_v27, %v8868_v9  ;;  %v3184_v27 = vsel %vm115_vm2, %v8925_v8, 0 }
  0xfd   :  { %v123_v42 = vand.u32 4294901760, %v114_v39  ;;  %v199_v43 = vand.u32 4294901760, %v198_v40  ;;  %v1138_v30 = vmul.f32 %v8567_v28, %v8870_v10 }
  0xff   :  { %v7784_v44 = vpack.c.bf16 %v123_v42, %v120_v37  ;;  %v205_v45 = vsub.f32 %v114_v39, %v123_v42  ;;  %v200_v47 = vsub.f32 %v198_v40, %v199_v43  ;;  %v1210_v37 = vsub.f32 %v1140_v31, %v8933_v34  ;;  %v2151_v42 = vpop.xlane.xlu1 %2150 }
 0x100   :  { %v3253_v31 = vand.u32 4294901760, %v3184_v27 }
 0x101   :  { %7785 = vmatpush3.bf16.msra.mxu0 %v7784_v44  ;;  %v206_v48 = vand.u32 4294901760, %v205_v45  ;;  %v201_v50 = vand.u32 4294901760, %v200_v47  ;;  %v7790_v53 = vpack.c.bf16 %v205_v45, %v198_v40  ;;  %v1211_v9 = vand.u32 4294901760, %v1210_v37 }
 0x102   :  { %7786 = vmatprep.subr.bf16.mxu0 %v8723_v6 }
 0x103   :  { %v207_v49 = vsub.f32 %v205_v45, %v206_v48  ;;  %v7796_v61 = vpack.c.bf16 %v206_v48, %v199_v43  ;;  %v1212_v41 = vsub.f32 %v1210_v37, %v1211_v9  ;;  %v2154_v48 = vpop.xlane.xlu1 %2153 }
 0x104   :  { %6870 = vmatmul.mubr.f32.vlgmr.msra.gmra.mrb[0].mxu0 %v190_v46 }
 0x105   :  { %v208_v51 = vand.u32 4294901760, %v207_v49  ;;  %6876 = vmatprep.mubr.msk.f32.mxu0 %vm8724_vm1, %v8725_v7  ;;  %v1213_v46 = vand.u32 4294901760, %v1212_v41  ;;  %v2155_v49 = vmax.f32 %v2151_v42, 1e-24 }
 0x107   :  { %v7787_v52 = vpack.c.bf16 %v208_v51, %v201_v50  ;;  %v2156_v50 = vmax.f32 %v2154_v48, 1e-24  ;;  %8568 = vrsqrt.f32 %v2155_v49 }
 0x109   :  { %7788 = vmatpush3.bf16.msra.mxu0 %v7787_v52  ;;  %8570 = vrsqrt.f32 %v2156_v50 }
 0x10a   :  { %7789 = vmatprep.subr.bf16.mxu0 %v8723_v6 }
 0x10c   :  { %6877 = vmatmul.mubr.f32.vlgmr.msra.gmra.mrb[0].mxu0 %v186_v32 }
 0x10d   :  { %7791 = vmatpush3.bf16.msra.mxu0 %v7790_v53  ;;  %6883 = vmatprep.mubr.msk.f32.mxu0 %vm8724_vm1, %v8725_v7  ;;  %v594_v54 = vpop.trf.xlu0 }
 0x10e   :  { %7792 = vmatprep.subr.bf16.mxu0 %v8723_v6  ;;  %v612_v55 = vsel %vm610_vm3, %v594_v54, 0 }
 0x10f   :  { %v8907_v56 = vand.u32 4294901760, %v612_v55 }
 0x111   :  { %v684_v57 = vsub.f32 %v612_v55, %v8907_v56  ;;  %v595_v0 = vpop.trf.xlu0  ;;  %v8569_v52 = vpop.eup %8568 }
 0x112   :  { %v615_v1 = vsel %vm610_vm3, %v595_v0, 0  ;;  %v2159_v54 = vmul.f32 %v8569_v52, %v8876_v13 }
 0x113   :  { %v685_v58 = vand.u32 4294901760, %v684_v57  ;;  %v8922_v2 = vand.u32 4294901760, %v615_v1  ;;  %v8571_v53 = vpop.eup %8570 }
 0x114   :  { %6884 = vmatmul.mubr.f32.vlgmr.msra.gmra.mrb[0].mxu0 %v187_v33  ;;  %v1146_v33 = vand.u32 4294901760, %v1138_v30  ;;  %v2160_v55 = vmul.f32 %v8571_v53, %v8882_v17 }
 0x115   :  { %7794 = vmatpush3.bf16.msra.mxu0 %v7784_v44  ;;  %6890 = vmatprep.mubr.msk.f32.mxu0 %vm8724_vm1, %v8725_v7  ;;  %v686_v59 = vsub.f32 %v684_v57, %v685_v58  ;;  %v694_v3 = vsub.f32 %v615_v1, %v8922_v2 }
 0x116   :  { %7795 = vmatprep.subr.bf16.mxu0 %v8723_v6 }
 0x117   :  { %v687_v60 = vand.u32 4294901760, %v686_v59  ;;  %v695_v4 = vand.u32 4294901760, %v694_v3  ;;  %v2168_v59 = vand.u32 4294901760, %v2160_v55 }
 0x119   :  { %6909 = vmatprep.mubr.f32.mxu1 %v687_v60  ;;  %v696_v11 = vsub.f32 %v694_v3, %v695_v4  ;;  %v2250_v62 = vsub.f32 %v2160_v55, %v2168_v59 }
 0x11b   :  { %v697_v18 = vand.u32 4294901760, %v696_v11  ;;  %v2251_v0 = vand.u32 4294901760, %v2250_v62 }
 0x11c   :  { %6891 = vmatmul.mubr.f32.vlgmr.msra.gmra.mrb[0].mxu0 %v188_v36  ;;  %v1228_v36 = vsub.f32 %v1138_v30, %v1146_v33 }
 0x11d   :  { %7797 = vmatpush3.bf16.msra.mxu0 %v7796_v61  ;;  %6897 = vmatprep.mubr.msk.f32.mxu0 %vm8724_vm1, %v8725_v7 }
 0x11e   :  { %7798 = vmatprep.subr.bf16.mxu0 %v8723_v6  ;;  %v1229_v39 = vand.u32 4294901760, %v1228_v36 }
 0x120   :  { %v1230_v40 = vsub.f32 %v1228_v36, %v1229_v39 }
 0x122   :  { %v1231_v45 = vand.u32 4294901760, %v1230_v40 }
 0x124   :  { %6898 = vmatmul.mubr.f32.vlgmr.msra.gmra.mrb[0].mxu0 %v186_v32 }
 0x125   :  { %7800 = vmatpush3.bf16.msra.mxu0 %v7784_v44  ;;  %6904 = vmatprep.mubr.msk.f32.mxu0 %vm8724_vm1, %v8725_v7 }
 0x12c   :  { %6905 = vmatmul.mubr.f32.vlgmr.msra.gmra.mrb[0].mxu0 %v186_v32  ;;  %v1143_v32 = vand.u32 4294901760, %v1137_v29 }
 0x12e   :  { %v1221_v35 = vsub.f32 %v1137_v29, %v1143_v32  ;;  %v7802_v43 = vpack.c.bf16 %v1146_v33, %v1143_v32 }
 0x130   :  { %v1222_v38 = vand.u32 4294901760, %v1221_v35  ;;  %v7808_v51 = vpack.c.bf16 %v1228_v36, %v1221_v35 }
 0x132   :  { %v1223_v10 = vsub.f32 %v1221_v35, %v1222_v38 }
 0x134   :  { %v1224_v44 = vand.u32 4294901760, %v1223_v10 }
 0x136   :  { %v7805_v47 = vpack.c.bf16 %v1231_v45, %v1224_v44 }
 0x1ff   :  { %v574_v12 = vpop.f32.mrb[0].mxu0 }
 0x200   :  { %v618_v14 = vand.u32 4294901760, %v574_v12  ;;  %v6906_v15 = vpop.f32.mrb[1].mxu0 }
 0x202   :  { %v705_v16 = vsub.f32 %v574_v12, %v618_v14  ;;  %6907 = vmatprep.subr.mxu1 %v618_v14 }
 0x203   :  { %6908 = vmatpush3.msra.mxu1 %v618_v14 }
 0x204   :  { %6910 = vmatmul.mubr.f32.vlgmr.msra.gmra.mrb[0].mxu1 %v697_v18  ;;  %v706_v21 = vand.u32 4294901760, %v705_v16 }
 0x205   :  { %6914 = vmatprep.mubr.f32.mxu1 %v8907_v56 }
 0x206   :  { %v707_v24 = vsub.f32 %v705_v16, %v706_v21 }
 0x208   :  { %v708_v26 = vand.u32 4294901760, %v707_v24 }
 0x20a   :  { %6912 = vmatprep.subr.mxu1 %v708_v26 }
 0x20b   :  { %6913 = vmatpush3.msra.mxu1 %v708_v26 }
 0x20c   :  { %6915 = vmatmul.mubr.f32.vlgmr.msra.gmra.mrb[0].mxu1 %v8922_v2  ;;  %6917 = vmatprep.subr.mxu1 %v705_v16 }
 0x20d   :  { %6918 = vmatpush3.msra.mxu1 %v705_v16  ;;  %6919 = vmatprep.mubr.f32.mxu1 %v684_v57  ;;  %v7814_v57 = vpack.c.bf16 %v1229_v39, %v1222_v38 }
 0x20e   :  { %6922 = vmatprep.subr.mxu1 %v618_v14 }
 0x214   :  { %6920 = vmatmul.mubr.f32.vlgmr.msra.gmra.mrb[0].mxu1 %v694_v3 }
 0x215   :  { %6923 = vmatpush3.msra.mxu1 %v618_v14  ;;  %6924 = vmatprep.mubr.f32.mxu1 %v685_v58  ;;  %v2165_v58 = vand.u32 4294901760, %v2159_v54 }
 0x216   :  { %6927 = vmatprep.subr.mxu1 %v706_v21 }
 0x217   :  { %v2243_v61 = vsub.f32 %v2159_v54, %v2165_v58  ;;  %v7820_v5 = vpack.c.bf16 %v2168_v59, %v2165_v58 }
 0x219   :  { %v2244_v17 = vand.u32 4294901760, %v2243_v61 }
 0x21b   :  { %v2245_v1 = vsub.f32 %v2243_v61, %v2244_v17  ;;  %v7832_v28 = vpack.c.bf16 %v2251_v0, %v2244_v17  ;;  %v2639_v17 = vpop.trf.xlu0 }
 0x21c   :  { %6925 = vmatmul.mubr.f32.vlgmr.msra.gmra.mrb[0].mxu1 %v695_v4  ;;  %v3173_v4 = vpop.xlane.xlu1 %3172 }
 0x21d   :  { %6928 = vmatpush3.msra.mxu1 %v706_v21  ;;  %6929 = vmatprep.mubr.f32.mxu1 %v8907_v56  ;;  %v2246_v11 = vand.u32 4294901760, %v2245_v1  ;;  %v3177_v18 = vmax.f32 %v3173_v4, 1e-24  ;;  %v7826_v21 = vpack.c.bf16 %v2250_v62, %v2243_v61 }
 0x21e   :  { %6932 = vmatprep.subr.mxu1 %v618_v14 }
 0x21f   :  { %8572 = vrsqrt.f32 %v3177_v18 }
 0x220   :  { %v3176_v16 = vpop.xlane.xlu1 %3175 }
 0x221   :  { %v3178_v19 = vmax.f32 %v3176_v16, 1e-24 }
 0x223   :  { %8574 = vrsqrt.f32 %v3178_v19 }
 0x224   :  { %6930 = vmatmul.mubr.f32.vlgmr.msra.gmra.mrb[0].mxu1 %v8922_v2  ;;  %v1617_v42 = vpop.trf.xlu1 }
 0x225   :  { %6933 = vmatpush3.msra.mxu1 %v618_v14  ;;  %6934 = vmatprep.mubr.f32.mxu1 %v8907_v56  ;;  %v2162_v56 = vsel %vm115_vm2, %v8918_v63, 0 }
 0x226   :  { %7801 = vmatprep.subr.bf16.mxu1 %v8723_v6  ;;  %v8958_v60 = vand.u32 4294901760, %v2162_v56 }
 0x228   :  { %v2232_v13 = vsub.f32 %v2162_v56, %v8958_v60  ;;  %v1618_v52 = vpop.trf.xlu1 }
 0x229   :  { %v8573_v22 = vpop.eup %8572  ;;  %v1637_v53 = vsel %vm610_vm3, %v1618_v52, 0 }
 0x22a   :  { %v2233_v63 = vand.u32 4294901760, %v2232_v13  ;;  %v3181_v25 = vmul.f32 %v8573_v22, %v8887_v20  ;;  %v1715_v54 = vand.u32 4294901760, %v1637_v53 }
 0x22c   :  { %6935 = vmatmul.mubr.f32.vlgmr.msra.gmra.mrb[0].mxu1 %v8922_v2  ;;  %v2252_v2 = vsub.f32 %v2250_v62, %v2251_v0  ;;  %v2234_v3 = vsub.f32 %v2232_v13, %v2233_v63  ;;  %v3187_v29 = vand.u32 4294901760, %v3181_v25  ;;  %v1716_v55 = vsub.f32 %v1637_v53, %v1715_v54 }
 0x22d   :  { %7803 = vmatpush3.bf16.msra.mxu1 %v7802_v43  ;;  %6941 = vmatprep.mubr.msk.f32.mxu1 %vm8724_vm1, %v8725_v7  ;;  %v8575_v24 = vpop.eup %8574  ;;  %v2656_v0 = vsel %vm610_vm3, %v2639_v17, 0 }
 0x22e   :  { %7804 = vmatprep.subr.bf16.mxu1 %v8723_v6  ;;  %v2253_v12 = vand.u32 4294901760, %v2252_v2  ;;  %v2235_v14 = vand.u32 4294901760, %v2234_v3  ;;  %v3182_v26 = vmul.f32 %v8575_v24, %v8892_v23  ;;  %v3265_v32 = vsub.f32 %v3181_v25, %v3187_v29 }
 0x22f   :  { %v1717_v56 = vand.u32 4294901760, %v1716_v55  ;;  %v2727_v1 = vand.u32 4294901760, %v2656_v0 }
 0x230   :  { %6942 = vmatmul.mubr.f32.vlgmr.msra.gmra.mrb[2].mxu1 %v1213_v46  ;;  %v7823_v15 = vpack.c.bf16 %v2253_v12, %v2246_v11  ;;  %v3190_v30 = vand.u32 4294901760, %v3182_v26  ;;  %v3266_v20 = vand.u32 4294901760, %v3265_v32 }
 0x231   :  { %7806 = vmatpush3.bf16.msra.mxu1 %v7805_v47  ;;  %6948 = vmatprep.mubr.msk.f32.mxu1 %vm8724_vm1, %v8725_v7  ;;  %v2728_v4 = vsub.f32 %v2656_v0, %v2727_v1 }
 0x232   :  { %7807 = vmatprep.subr.bf16.mxu1 %v8723_v6  ;;  %v3272_v33 = vsub.f32 %v3182_v26, %v3190_v30  ;;  %v3267_v8 = vsub.f32 %v3265_v32, %v3266_v20  ;;  %v7838_v38 = vpack.c.bf16 %v3190_v30, %v3187_v29 }
 0x233   :  { %v2729_v11 = vand.u32 4294901760, %v2728_v4 }
 0x234   :  { %v3273_v35 = vand.u32 4294901760, %v3272_v33  ;;  %v3268_v39 = vand.u32 4294901760, %v3267_v8  ;;  %v7844_v41 = vpack.c.bf16 %v3272_v33, %v3265_v32 }
 0x236   :  { %v3274_v36 = vsub.f32 %v3272_v33, %v3273_v35  ;;  %v7850_v46 = vpack.c.bf16 %v3273_v35, %v3266_v20 }
 0x238   :  { %6949 = vmatmul.mubr.f32.vlgmr.msra.gmra.mrb[2].mxu1 %v8933_v34 }
 0x239   :  { %7809 = vmatpush3.bf16.msra.mxu1 %v7808_v51  ;;  %6955 = vmatprep.mubr.msk.f32.mxu1 %vm8724_vm1, %v8725_v7 }
 0x23a   :  { %7810 = vmatprep.subr.bf16.mxu1 %v8723_v6 }
 0x240   :  { %6956 = vmatmul.mubr.f32.vlgmr.msra.gmra.mrb[2].mxu1 %v1210_v37 }
 0x241   :  { %7812 = vmatpush3.bf16.msra.mxu1 %v7802_v43  ;;  %6962 = vmatprep.mubr.msk.f32.mxu1 %vm8724_vm1, %v8725_v7 }
 0x242   :  { %7813 = vmatprep.subr.bf16.mxu1 %v8723_v6 }
 0x248   :  { %6963 = vmatmul.mubr.f32.vlgmr.msra.gmra.mrb[2].mxu1 %v1211_v9  ;;  %v3275_v9 = vand.u32 4294901760, %v3274_v36 }
 0x249   :  { %7815 = vmatpush3.bf16.msra.mxu1 %v7814_v57  ;;  %6969 = vmatprep.mubr.msk.f32.mxu1 %vm8724_vm1, %v8725_v7 }
 0x24a   :  { %7816 = vmatprep.subr.bf16.mxu1 %v8723_v6  ;;  %v7841_v40 = vpack.c.bf16 %v3275_v9, %v3268_v39 }
 0x250   :  { %6970 = vmatmul.mubr.f32.vlgmr.msra.gmra.mrb[2].mxu1 %v8933_v34 }
 0x251   :  { %7818 = vmatpush3.bf16.msra.mxu1 %v7802_v43  ;;  %6976 = vmatprep.mubr.msk.f32.mxu1 %vm8724_vm1, %v8725_v7  ;;  %v1634_v43 = vsel %vm610_vm3, %v1617_v42, 0 }
 0x252   :  { %7819 = vmatprep.subr.bf16.mxu1 %v8723_v6  ;;  %v1705_v44 = vand.u32 4294901760, %v1634_v43 }
 0x254   :  { %v1706_v45 = vsub.f32 %v1634_v43, %v1705_v44 }
 0x256   :  { %v1707_v47 = vand.u32 4294901760, %v1706_v45 }
 0x258   :  { %6977 = vmatmul.mubr.f32.vlgmr.msra.gmra.mrb[2].mxu1 %v8933_v34  ;;  %v3254_v34 = vsub.f32 %v3184_v27, %v3253_v31  ;;  %v1708_v48 = vsub.f32 %v1706_v45, %v1707_v47 }
 0x259   :  { %7821 = vmatpush3.bf16.msra.mxu1 %v7820_v5  ;;  %7013 = vmatprep.mubr.msk.f32.mxu1 %vm8724_vm1, %v8725_v7 }
 0x25a   :  { %7822 = vmatprep.subr.bf16.mxu1 %v8723_v6  ;;  %v3255_v23 = vand.u32 4294901760, %v3254_v34  ;;  %v1709_v49 = vand.u32 4294901760, %v1708_v48 }
 0x25c   :  { %7014 = vmatmul.mubr.f32.vlgmr.msra.gmra.mrb[4].mxu1 %v2235_v14  ;;  %v3256_v37 = vsub.f32 %v3254_v34, %v3255_v23  ;;  %6981 = vmatprep.mubr.f32.mxu0 %v1709_v49  ;;  %v2730_v14 = vsub.f32 %v2728_v4, %v2729_v11 }
 0x25d   :  { %7824 = vmatpush3.bf16.msra.mxu1 %v7823_v15  ;;  %7020 = vmatprep.mubr.msk.f32.mxu1 %vm8724_vm1, %v8725_v7 }
 0x25e   :  { %7825 = vmatprep.subr.bf16.mxu1 %v8723_v6  ;;  %v3257_v10 = vand.u32 4294901760, %v3256_v37  ;;  %v2731_v18 = vand.u32 4294901760, %v2730_v14 }
 0x264   :  { %7021 = vmatmul.mubr.f32.vlgmr.msra.gmra.mrb[4].mxu1 %v8958_v60 }
 0x265   :  { %7827 = vmatpush3.bf16.msra.mxu1 %v7826_v21  ;;  %7027 = vmatprep.mubr.msk.f32.mxu1 %vm8724_vm1, %v8725_v7 }
 0x266   :  { %7828 = vmatprep.subr.bf16.mxu1 %v8723_v6 }
 0x26c   :  { %7028 = vmatmul.mubr.f32.vlgmr.msra.gmra.mrb[4].mxu1 %v2232_v13 }
 0x26d   :  { %7830 = vmatpush3.bf16.msra.mxu1 %v7820_v5  ;;  %7034 = vmatprep.mubr.msk.f32.mxu1 %vm8724_vm1, %v8725_v7 }
 0x26e   :  { %7831 = vmatprep.subr.bf16.mxu1 %v8723_v6 }
 0x274   :  { %7035 = vmatmul.mubr.f32.vlgmr.msra.gmra.mrb[4].mxu1 %v2233_v63  ;;  %v2640_v63 = vpop.trf.xlu0 }
 0x275   :  { %7833 = vmatpush3.bf16.msra.mxu1 %v7832_v28  ;;  %7041 = vmatprep.mubr.msk.f32.mxu1 %vm8724_vm1, %v8725_v7  ;;  %v2659_v2 = vsel %vm610_vm3, %v2640_v63, 0 }
 0x276   :  { %7834 = vmatprep.subr.bf16.mxu1 %v8723_v6  ;;  %v2737_v3 = vand.u32 4294901760, %v2659_v2 }
 0x278   :  { %v3661_v28 = vpop.trf.xlu0 }
 0x279   :  { %v3678_v29 = vsel %vm610_vm3, %v3661_v28, 0  ;;  %v9058_v28 = vld [vmem:[#allocation6 + $0x20] sm:$0xff] }
 0x27c   :  { %7042 = vmatmul.mubr.f32.vlgmr.msra.gmra.mrb[4].mxu1 %v8958_v60  ;;  %v3662_v30 = vpop.trf.xlu0 }
 0x27d   :  { %7836 = vmatpush3.bf16.msra.mxu1 %v7820_v5  ;;  %7048 = vmatprep.mubr.msk.f32.mxu1 %vm8724_vm1, %v8725_v7  ;;  %v2738_v5 = vsub.f32 %v2659_v2, %v2737_v3  ;;  %v3681_v32 = vsel %vm610_vm3, %v3662_v30, 0 }
 0x27e   :  { %7837 = vmatprep.subr.bf16.mxu1 %v8723_v6  ;;  %v3759_v33 = vand.u32 4294901760, %v3681_v32 }
 0x27f   :  { %v2739_v12 = vand.u32 4294901760, %v2738_v5 }
 0x280   :  { %v3760_v20 = vsub.f32 %v3681_v32, %v3759_v33  ;;  %v4284_v32 = vand.u32 4294901760, %v9058_v28 }
 0x281   :  { %v2740_v15 = vsub.f32 %v2738_v5, %v2739_v12 }
 0x283   :  { %v2741_v22 = vand.u32 4294901760, %v2740_v15 }
 0x284   :  { %7049 = vmatmul.mubr.f32.vlgmr.msra.gmra.mrb[4].mxu1 %v8958_v60 }
 0x285   :  { %7839 = vmatpush3.bf16.msra.mxu1 %v7838_v38  ;;  %7085 = vmatprep.mubr.msk.f32.mxu1 %vm8724_vm1, %v8725_v7 }
 0x286   :  { %7840 = vmatprep.subr.bf16.mxu1 %v8723_v6 }
 0x288   :  { %7086 = vmatmul.mubr.f32.vlgmr.msra.gmra.mrb[6].mxu1 %v3257_v10 }
 0x289   :  { %7842 = vmatpush3.bf16.msra.mxu1 %v7841_v40  ;;  %7092 = vmatprep.mubr.msk.f32.mxu1 %vm8724_vm1, %v8725_v7 }
 0x28a   :  { %7843 = vmatprep.subr.bf16.mxu1 %v8723_v6 }
 0x290   :  { %7093 = vmatmul.mubr.f32.vlgmr.msra.gmra.mrb[6].mxu1 %v3253_v31 }
 0x291   :  { %7845 = vmatpush3.bf16.msra.mxu1 %v7844_v41  ;;  %7099 = vmatprep.mubr.msk.f32.mxu1 %vm8724_vm1, %v8725_v7 }
 0x292   :  { %7846 = vmatprep.subr.bf16.mxu1 %v8723_v6 }
 0x298   :  { %7100 = vmatmul.mubr.f32.vlgmr.msra.gmra.mrb[6].mxu1 %v3254_v34 }
 0x299   :  { %7848 = vmatpush3.bf16.msra.mxu1 %v7838_v38  ;;  %7106 = vmatprep.mubr.msk.f32.mxu1 %vm8724_vm1, %v8725_v7 }
 0x29a   :  { %7849 = vmatprep.subr.bf16.mxu1 %v8723_v6 }
 0x2a0   :  { %7107 = vmatmul.mubr.f32.vlgmr.msra.gmra.mrb[6].mxu1 %v3255_v23  ;;  %v3761_v23 = vand.u32 4294901760, %v3760_v20 }
 0x2a1   :  { %7851 = vmatpush3.bf16.msra.mxu1 %v7850_v46  ;;  %7113 = vmatprep.mubr.msk.f32.mxu1 %vm8724_vm1, %v8725_v7 }
 0x2a2   :  { %7852 = vmatprep.subr.bf16.mxu1 %v8723_v6  ;;  %v1718_v6 = vsub.f32 %v1716_v55, %v1717_v56  ;;  %v3762_v36 = vsub.f32 %v3760_v20, %v3761_v23 }
 0x2a4   :  { %v1719_v60 = vand.u32 4294901760, %v1718_v6  ;;  %v3763_v10 = vand.u32 4294901760, %v3762_v36 }
 0x2a8   :  { %7114 = vmatmul.mubr.f32.vlgmr.msra.gmra.mrb[6].mxu1 %v3253_v31 }
 0x2a9   :  { %7854 = vmatpush3.bf16.msra.mxu1 %v7838_v38  ;;  %7120 = vmatprep.mubr.msk.f32.mxu1 %vm8724_vm1, %v8725_v7 }
 0x2b0   :  { %7121 = vmatmul.mubr.f32.vlgmr.msra.gmra.mrb[6].mxu1 %v3253_v31  ;;  %v3749_v31 = vand.u32 4294901760, %v3678_v29 }
 0x2b2   :  { %v3750_v34 = vsub.f32 %v3678_v29, %v3749_v31  ;;  %v9060_v29 = vld [vmem:[#allocation6 + $0x28] sm:$0xff] }
 0x2b4   :  { %v3751_v35 = vand.u32 4294901760, %v3750_v34 }
 0x2b6   :  { %v3752_v8 = vsub.f32 %v3750_v34, %v3751_v35 }
 0x2b8   :  { %v3753_v38 = vand.u32 4294901760, %v3752_v8 }
 0x2ff   :  { %v9012_v50 = vpop.f32.mrb[0].mxu1 }
 0x300   :  { %v9014_v51 = vpop.f32.mrb[1].mxu1 }
 0x32b   :  { %v1597_v57 = vpop.f32.mrb[2].mxu1 }
 0x32c   :  { %v1640_v58 = vand.u32 4294901760, %v1597_v57  ;;  %v6978_v59 = vpop.f32.mrb[3].mxu1 }
 0x32e   :  { %v1727_v61 = vsub.f32 %v1597_v57, %v1640_v58  ;;  %6979 = vmatprep.subr.mxu0 %v1640_v58 }
 0x32f   :  { %6980 = vmatpush3.msra.mxu0 %v1640_v58 }
 0x330   :  { %6982 = vmatmul.mubr.f32.vlgmr.msra.gmra.mrb[2].mxu0 %v1719_v60  ;;  %v1728_v7 = vand.u32 4294901760, %v1727_v61 }
 0x331   :  { %6986 = vmatprep.mubr.f32.mxu0 %v1705_v44 }
 0x332   :  { %v1729_v62 = vsub.f32 %v1727_v61, %v1728_v7 }
 0x334   :  { %v1730_v13 = vand.u32 4294901760, %v1729_v62  ;;  %v1106_v62 = vmul.f32 %v9014_v51, %v9014_v51 }
 0x336   :  { %6984 = vmatprep.subr.mxu0 %v1730_v13  ;;  %v1108_v0 = vsel %vm102_vm0, %v1106_v62, 0.0  ;;  %v9160_v62 = vld [vmem:[#allocation6 + $0x78] sm:$0xff] }
 0x337   :  { %6985 = vmatpush3.msra.mxu0 %v1730_v13 }
 0x338   :  { %6987 = vmatmul.mubr.f32.vlgmr.msra.gmra.mrb[2].mxu0 %v1715_v54  ;;  %6989 = vmatprep.subr.mxu0 %v1727_v61 }
 0x339   :  { %6990 = vmatpush3.msra.mxu0 %v1727_v61  ;;  %6991 = vmatprep.mubr.f32.mxu0 %v1706_v45  ;;  %v1107_v61 = vmul.f32 %v9012_v50, %v9012_v50 }
 0x33a   :  { %6994 = vmatprep.subr.mxu0 %v1640_v58 }
 0x33b   :  { %v1111_v17 = vsel %vm102_vm0, %v1107_v61, 0.0 }
 0x340   :  { %6992 = vmatmul.mubr.f32.vlgmr.msra.gmra.mrb[2].mxu0 %v1716_v55 }
 0x341   :  { %6995 = vmatpush3.msra.mxu0 %v1640_v58  ;;  %6996 = vmatprep.mubr.f32.mxu0 %v1707_v47 }
 0x342   :  { %6999 = vmatprep.subr.mxu0 %v1728_v7 }
 0x348   :  { %6997 = vmatmul.mubr.f32.vlgmr.msra.gmra.mrb[2].mxu0 %v1717_v56 }
 0x349   :  { %7000 = vmatpush3.msra.mxu0 %v1728_v7  ;;  %7001 = vmatprep.mubr.f32.mxu0 %v1705_v44 }
 0x34a   :  { %7004 = vmatprep.subr.mxu0 %v1640_v58 }
 0x350   :  { %7002 = vmatmul.mubr.f32.vlgmr.msra.gmra.mrb[2].mxu0 %v1715_v54 }
 0x351   :  { %7005 = vmatpush3.msra.mxu0 %v1640_v58  ;;  %7006 = vmatprep.mubr.f32.mxu0 %v1705_v44 }
 0x357   :  { %v2619_v16 = vpop.f32.mrb[4].mxu1 }
 0x358   :  { %v2662_v19 = vand.u32 4294901760, %v2619_v16  ;;  %7007 = vmatmul.mubr.f32.vlgmr.msra.gmra.mrb[2].mxu0 %v1715_v54  ;;  %v7050_v21 = vpop.f32.mrb[5].mxu1 }
 0x359   :  { %7053 = vmatprep.mubr.f32.mxu0 %v2731_v18  ;;  %v9049_v21 = vld [vmem:[#allocation6 + $0x8] sm:$0xff] }
 0x35a   :  { %v2749_v24 = vsub.f32 %v2619_v16, %v2662_v19  ;;  %7051 = vmatprep.subr.mxu0 %v2662_v19 }
 0x35b   :  { %7052 = vmatpush3.msra.mxu0 %v2662_v19 }
 0x35c   :  { %7054 = vmatmul.mubr.f32.vlgmr.msra.gmra.mrb[4].mxu0 %v2741_v22  ;;  %v2750_v25 = vand.u32 4294901760, %v2749_v24  ;;  %v9051_v22 = vld [vmem:[#allocation6 + $0x10] sm:$0xff] }
 0x35d   :  { %7058 = vmatprep.mubr.f32.mxu0 %v2727_v1 }
 0x35e   :  { %v2751_v26 = vsub.f32 %v2749_v24, %v2750_v25 }
 0x360   :  { %v2752_v27 = vand.u32 4294901760, %v2751_v26  ;;  %v9055_v26 = vld [vmem:[#allocation6 + $0x18] sm:$0xff] }
 0x361   :  { %v4281_v30 = vand.u32 4294901760, %v9055_v26 }
 0x362   :  { %7056 = vmatprep.subr.mxu0 %v2752_v27 }
 0x363   :  { %7057 = vmatpush3.msra.mxu0 %v2752_v27  ;;  %v4278_v27 = vand.u32 4294901760, %v9051_v22 }
 0x364   :  { %7059 = vmatmul.mubr.f32.vlgmr.msra.gmra.mrb[4].mxu0 %v2737_v3  ;;  %7061 = vmatprep.subr.mxu0 %v2749_v24 }
 0x365   :  { %7062 = vmatpush3.msra.mxu0 %v2749_v24  ;;  %7063 = vmatprep.mubr.f32.mxu0 %v2728_v4 }
 0x366   :  { %7066 = vmatprep.subr.mxu0 %v2662_v19 }
 0x36c   :  { %7064 = vmatmul.mubr.f32.vlgmr.msra.gmra.mrb[4].mxu0 %v2738_v5 }
 0x36d   :  { %7067 = vmatpush3.msra.mxu0 %v2662_v19  ;;  %7068 = vmatprep.mubr.f32.mxu0 %v2729_v11 }
 0x36e   :  { %7071 = vmatprep.subr.mxu0 %v2750_v25 }
 0x374   :  { %7069 = vmatmul.mubr.f32.vlgmr.msra.gmra.mrb[4].mxu0 %v2739_v12 }
 0x375   :  { %7072 = vmatpush3.msra.mxu0 %v2750_v25  ;;  %7073 = vmatprep.mubr.f32.mxu0 %v2727_v1  ;;  %v4275_v25 = vand.u32 4294901760, %v9049_v21 }
 0x376   :  { %7076 = vmatprep.subr.mxu0 %v2662_v19 }
 0x37c   :  { %7074 = vmatmul.mubr.f32.vlgmr.msra.gmra.mrb[4].mxu0 %v2737_v3 }
 0x37d   :  { %7077 = vmatpush3.msra.mxu0 %v2662_v19  ;;  %7078 = vmatprep.mubr.f32.mxu0 %v2727_v1  ;;  %v9047_v19 = vld [vmem:[#allocation6] sm:$0xff] }
 0x37e   :  { %v4272_v24 = vand.u32 4294901760, %v9047_v19 }
 0x383   :  { %v3641_v37 = vpop.f32.mrb[6].mxu1 }
 0x384   :  { %v3684_v39 = vand.u32 4294901760, %v3641_v37  ;;  %7079 = vmatmul.mubr.f32.vlgmr.msra.gmra.mrb[4].mxu0 %v2737_v3  ;;  %v7122_v9 = vpop.f32.mrb[7].mxu1 }
 0x385   :  { %7125 = vmatprep.mubr.f32.mxu0 %v3753_v38  ;;  %v9097_v9 = vld [vmem:[#allocation6 + $0x48] sm:$0xff] }
 0x386   :  { %v3771_v40 = vsub.f32 %v3641_v37, %v3684_v39  ;;  %7123 = vmatprep.subr.mxu0 %v3684_v39 }
 0x387   :  { %7124 = vmatpush3.msra.mxu0 %v3684_v39 }
 0x388   :  { %7126 = vmatmul.mubr.f32.vlgmr.msra.gmra.mrb[6].mxu0 %v3763_v10  ;;  %v3772_v41 = vand.u32 4294901760, %v3771_v40 }
 0x389   :  { %7130 = vmatprep.mubr.f32.mxu0 %v3749_v31 }
 0x38a   :  { %v3773_v42 = vsub.f32 %v3771_v40, %v3772_v41 }
 0x38c   :  { %v3774_v43 = vand.u32 4294901760, %v3773_v42 }
 0x38e   :  { %7128 = vmatprep.subr.mxu0 %v3774_v43 }
 0x38f   :  { %7129 = vmatpush3.msra.mxu0 %v3774_v43  ;;  %v4299_v43 = vand.u32 4294901760, %v9097_v9 }
 0x390   :  { %7131 = vmatmul.mubr.f32.vlgmr.msra.gmra.mrb[6].mxu0 %v3759_v33  ;;  %7133 = vmatprep.subr.mxu0 %v3771_v40 }
 0x391   :  { %7134 = vmatpush3.msra.mxu0 %v3771_v40  ;;  %7135 = vmatprep.mubr.f32.mxu0 %v3750_v34  ;;  %v9075_v34 = vpack.c.bf16 %v4281_v30, %v4278_v27 }
 0x392   :  { %7138 = vmatprep.subr.mxu0 %v3684_v39 }
 0x398   :  { %7136 = vmatmul.mubr.f32.vlgmr.msra.gmra.mrb[6].mxu0 %v3760_v20  ;;  %v9077_v20 = vld [vmem:[#allocation6 + $0x30] sm:$0xff] }
 0x399   :  { %7139 = vmatpush3.msra.mxu0 %v3684_v39  ;;  %7140 = vmatprep.mubr.f32.mxu0 %v3751_v35  ;;  %v9079_v35 = vld [vmem:[#allocation6 + $0x38] sm:$0xff]  ;;  %v4290_v37 = vand.u32 4294901760, %v9077_v20 }
 0x39a   :  { %7143 = vmatprep.subr.mxu0 %v3772_v41  ;;  %v4293_v38 = vand.u32 4294901760, %v9079_v35 }
 0x3a0   :  { %7141 = vmatmul.mubr.f32.vlgmr.msra.gmra.mrb[6].mxu0 %v3761_v23 }
 0x3a1   :  { %7144 = vmatpush3.msra.mxu0 %v3772_v41  ;;  %7145 = vmatprep.mubr.f32.mxu0 %v3749_v31  ;;  %v9109_v41 = vpack.c.bf16 %v4293_v38, %v4290_v37 }
 0x3a2   :  { %7148 = vmatprep.subr.mxu0 %v3684_v39 }
 0x3a8   :  { %7146 = vmatmul.mubr.f32.vlgmr.msra.gmra.mrb[6].mxu0 %v3759_v33 }
 0x3a9   :  { %7149 = vmatpush3.msra.mxu0 %v3684_v39  ;;  %7150 = vmatprep.mubr.f32.mxu0 %v3749_v31  ;;  %v9067_v31 = vpack.c.bf16 %v4275_v25, %v4272_v24  ;;  %v9095_v39 = vld [vmem:[#allocation6 + $0x40] sm:$0xff] }
 0x3aa   :  { %v4296_v42 = vand.u32 4294901760, %v9095_v39 }
 0x3ab   :  { %7952 = vmatprep.subr.bf16.mxu1 %v9067_v31  ;;  %7856 = vmatprep.subr.bf16.mxu0 %v9067_v31 }
 0x3ac   :  { %7954 = vmatpush3.bf16.msra.mxu1 %v9067_v31 }
 0x3ad   :  { %7956 = vmatprep.subr.bf16.mxu1 %v9075_v34 }
 0x3b0   :  { %7151 = vmatmul.mubr.f32.vlgmr.msra.gmra.mrb[6].mxu0 %v3759_v33  ;;  %v4287_v33 = vand.u32 4294901760, %v9060_v29  ;;  %7958 = vmatpush3.bf16.msra.mxu1 %v9075_v34 }
 0x3b1   :  { %7858 = vmatpush3.bf16.msra.mxu0 %v9067_v31 }
 0x3b2   :  { %7860 = vmatprep.subr.bf16.mxu0 %v9075_v34  ;;  %v9091_v36 = vpack.c.bf16 %v4287_v33, %v4284_v32 }
 0x3b4   :  { %7960 = vmatprep.subr.bf16.mxu1 %v9091_v36 }
 0x3b5   :  { %7862 = vmatpush3.bf16.msra.mxu0 %v9075_v34  ;;  %7962 = vmatpush3.bf16.msra.mxu1 %v9091_v36 }
 0x3b6   :  { %7864 = vmatprep.subr.bf16.mxu0 %v9091_v36  ;;  %7964 = vmatprep.subr.bf16.mxu1 %v9109_v41 }
 0x3b9   :  { %7866 = vmatpush3.bf16.msra.mxu0 %v9091_v36  ;;  %7966 = vmatpush3.bf16.msra.mxu1 %v9109_v41 }
 0x3ba   :  { %7868 = vmatprep.subr.bf16.mxu0 %v9109_v41 }
 0x3bd   :  { %7870 = vmatpush3.bf16.msra.mxu0 %v9109_v41 }
 0x42b   :  { %v7008_v44 = vpop.f32.mrb[2].mxu0 }
 0x42c   :  { %v2129_v45 = vmul.f32 %v7008_v44, %v7008_v44  ;;  %v2118_v46 = vpop.f32.mrb[3].mxu0 }
 0x42d   :  { %v2128_v47 = vmul.f32 %v2118_v46, %v2118_v46 }
 0x42e   :  { %v2133_v48 = vsel %vm102_vm0, %v2129_v45, 0.0  ;;  %v9115_v45 = vld [vmem:[#allocation6 + $0x58] sm:$0xff] }
 0x42f   :  { %2134 = vadd.xlane.f32.xlu1 %v2133_v48  ;;  %v2130_v49 = vsel %vm102_vm0, %v2128_v47, 0.0  ;;  %v4305_v48 = vand.u32 4294901760, %v9115_v45 }
 0x430   :  { %2131 = vadd.xlane.f32.xlu0 %v2130_v49 }
 0x457   :  { %v7080_v52 = vpop.f32.mrb[4].mxu0 }
 0x458   :  { %v3151_v53 = vmul.f32 %v7080_v52, %v7080_v52  ;;  %v9023_v54 = vpop.f32.mrb[5].mxu0 }
 0x459   :  { %v3150_v55 = vmul.f32 %v9023_v54, %v9023_v54 }
 0x45a   :  { %v3155_v56 = vsel %vm102_vm0, %v3151_v53, 0.0  ;;  %v9148_v53 = vld [vmem:[#allocation6 + $0x68] sm:$0xff] }
 0x45b   :  { %3156 = vadd.xlane.f32.xlu0 %v3155_v56  ;;  %v3152_v6 = vsel %vm102_vm0, %v3150_v55, 0.0  ;;  %v4311_v56 = vand.u32 4294901760, %v9148_v53 }
 0x45f   :  { %3153 = vadd.xlane.f32.xlu0 %v3152_v6 }
 0x483   :  { %v9029_v57 = vpop.f32.mrb[6].mxu0 }
 0x484   :  { %v4173_v58 = vmul.f32 %v9029_v57, %v9029_v57  ;;  %v9033_v59 = vpop.f32.mrb[7].mxu0 }
 0x485   :  { %v4172_v60 = vmul.f32 %v9033_v59, %v9033_v59 }
 0x486   :  { %v4177_v7 = vsel %vm102_vm0, %v4173_v58, 0.0 }
 0x487   :  { %4178 = vadd.xlane.f32.xlu0 %v4177_v7  ;;  %v4174_v13 = vsel %vm102_vm0, %v4172_v60, 0.0  ;;  %v9158_v7 = vld [vmem:[#allocation6 + $0x70] sm:$0xff] }
 0x488   :  { %4175 = vadd.xlane.f32.xlu1 %v4174_v13  ;;  %v4314_v13 = vand.u32 4294901760, %v9158_v7 }
 0x48b   :  { %1112 = vadd.xlane.f32.xlu0 %v1111_v17  ;;  %v4317_v17 = vand.u32 4294901760, %v9160_v62 }
 0x48c   :  { %1109 = vadd.xlane.f32.xlu1 %v1108_v0 }
 0x48d   :  { %v9172_v0 = vpack.c.bf16 %v4317_v17, %v4314_v13 }
 0x4bc   :  { %v2135_v63 = vpop.xlane.xlu1 %2134 }
 0x4bd   :  { %v2137_v1 = vmax.f32 %v2135_v63, 1e-24  ;;  %v2132_v2 = vpop.xlane.xlu0 %2131  ;;  %v9177_v63 = vsub.f32 %v9047_v19, %v4272_v24 }
 0x4be   :  { %v2136_v3 = vmax.f32 %v2132_v2, 1e-24 }
 0x4bf   :  { %8576 = vrsqrt.f32 %v2137_v1  ;;  %v9182_v1 = vsub.f32 %v9049_v21, %v4275_v25  ;;  %v4375_v2 = vand.u32 4294901760, %v9177_v63 }
 0x4c0   :  { %8578 = vrsqrt.f32 %v2136_v3 }
 0x4c1   :  { %v4382_v3 = vand.u32 4294901760, %v9182_v1 }
 0x4c9   :  { %v8577_v4 = vpop.eup %8576 }
 0x4ca   :  { %v8579_v5 = vpop.eup %8578  ;;  %v2141_v11 = vmul.f32 %v8577_v4, %v7008_v44  ;;  %v9113_v44 = vld [vmem:[#allocation6 + $0x50] sm:$0xff]  ;;  %v9190_v4 = vpack.c.bf16 %v4382_v3, %v4375_v2 }
 0x4cb   :  { %v2140_v12 = vmul.f32 %v8579_v5, %v2118_v46  ;;  %v9126_v46 = vpack.c.bf16 %v4299_v43, %v4296_v42  ;;  %v4302_v47 = vand.u32 4294901760, %v9113_v44  ;;  %v4376_v5 = vsub.f32 %v9177_v63, %v4375_v2 }
 0x4cc   :  { %4190 = vrot.lane.b32.xlu0 %v2141_v11, %s8726_s6  ;;  %v4383_v11 = vsub.f32 %v9182_v1, %v4382_v3 }
 0x4cd   :  { %4188 = vrot.lane.b32.xlu1 %v2140_v12, %s8726_s6  ;;  %7968 = vmatprep.subr.bf16.mxu1 %v9126_v46  ;;  %v9138_v49 = vpack.c.bf16 %v4305_v48, %v4302_v47  ;;  %v9197_v12 = vsub.f32 %v9051_v22, %v4278_v27 }
 0x4ce   :  { %7872 = vmatprep.subr.bf16.mxu0 %v9126_v46  ;;  %7970 = vmatpush3.bf16.msra.mxu1 %v9126_v46 }
 0x4cf   :  { %7874 = vmatpush3.bf16.msra.mxu0 %v9126_v46  ;;  %7972 = vmatprep.subr.bf16.mxu1 %v9138_v49 }
 0x4d0   :  { %7876 = vmatprep.subr.bf16.mxu0 %v9138_v49 }
 0x4d2   :  { %7974 = vmatpush3.bf16.msra.mxu1 %v9138_v49 }
 0x4d3   :  { %7878 = vmatpush3.bf16.msra.mxu0 %v9138_v49 }
 0x4e8   :  { %v3157_v14 = vpop.xlane.xlu0 %3156 }
 0x4e9   :  { %v3159_v15 = vmax.f32 %v3157_v14, 1e-24  ;;  %v9202_v14 = vsub.f32 %v9055_v26, %v4281_v30  ;;  %v9214_v26 = vsub.f32 %v9058_v28, %v4284_v32 }
 0x4eb   :  { %8580 = vrsqrt.f32 %v3159_v15  ;;  %v4377_v15 = vand.u32 4294901760, %v4376_v5  ;;  %v4396_v21 = vand.u32 4294901760, %v9202_v14  ;;  %v4403_v28 = vand.u32 4294901760, %v9214_v26  ;;  %v8592_v5 = vld [vmem:[#allocation2 + $0x18] sm:$0xff] }
 0x4ec   :  { %v3154_v16 = vpop.xlane.xlu0 %3153 }
 0x4ed   :  { %v3158_v18 = vmax.f32 %v3154_v16, 1e-24  ;;  %v4384_v16 = vand.u32 4294901760, %v4383_v11 }
 0x4ef   :  { %8582 = vrsqrt.f32 %v3158_v18  ;;  %v4389_v18 = vand.u32 4294901760, %v9197_v12 }
 0x4f1   :  { %v4390_v22 = vsub.f32 %v9197_v12, %v4389_v18  ;;  %v9217_v30 = vpack.c.bf16 %v4396_v21, %v4389_v18  ;;  %v4437_v18 = vsub.f32 %v9097_v9, %v4299_v43  ;;  %v4451_v9 = vsub.f32 %v9115_v45, %v4305_v48 }
 0x4f5   :  { %v8581_v23 = vpop.eup %8580 }
 0x4f6   :  { %v3163_v8 = vmul.f32 %v8581_v23, %v7080_v52  ;;  %v9146_v52 = vld [vmem:[#allocation6 + $0x60] sm:$0xff]  ;;  %v9208_v23 = vpack.c.bf16 %v4384_v16, %v4377_v15  ;;  %v4430_v15 = vsub.f32 %v9095_v39, %v4296_v42  ;;  %v4444_v39 = vsub.f32 %v9113_v44, %v4302_v47 }
 0x4f7   :  { %v4308_v55 = vand.u32 4294901760, %v9146_v52 }
 0x4f8   :  { %4198 = vrot.lane.b32.xlu1 %v3163_v8, %s8727_s17  ;;  %v4397_v8 = vsub.f32 %v9202_v14, %v4396_v21 }
 0x4f9   :  { %v8583_v10 = vpop.eup %8582  ;;  %v9156_v61 = vpack.c.bf16 %v4311_v56, %v4308_v55  ;;  %v4458_v45 = vsub.f32 %v9146_v52, %v4308_v55  ;;  %v4479_v52 = vsub.f32 %v9160_v62, %v4317_v17  ;;  %v9304_v62 = vpack.c.bf16 %v9182_v1, %v9177_v63 }
 0x4fa   :  { %v3162_v40 = vmul.f32 %v8583_v10, %v9023_v54  ;;  %v9223_v10 = vsub.f32 %v9060_v29, %v4287_v33  ;;  %v9234_v29 = vsub.f32 %v9077_v20, %v4290_v37  ;;  %v9239_v33 = vsub.f32 %v9079_v35, %v4293_v38  ;;  %v8593_v37 = vld [vmem:[#allocation2 + $0x10] sm:$0xff] }
 0x4fb   :  { %7976 = vmatprep.subr.bf16.mxu1 %v9156_v61  ;;  %7880 = vmatprep.subr.bf16.mxu0 %v9156_v61 }
 0x4fc   :  { %4196 = vrot.lane.b32.xlu1 %v3162_v40, %s8727_s17  ;;  %7978 = vmatpush3.bf16.msra.mxu1 %v9156_v61  ;;  %v4410_v32 = vand.u32 4294901760, %v9223_v10  ;;  %v4404_v40 = vsub.f32 %v9214_v26, %v4403_v28  ;;  %v4417_v2 = vand.u32 4294901760, %v9234_v29  ;;  %v4424_v3 = vand.u32 4294901760, %v9239_v33 }
 0x4fd   :  { %7882 = vmatpush3.bf16.msra.mxu0 %v9156_v61  ;;  %7980 = vmatprep.subr.bf16.mxu1 %v9172_v0  ;;  %v9312_v17 = vpack.c.bf16 %v9223_v10, %v9214_v26 }
 0x4fe   :  { %7884 = vmatprep.subr.bf16.mxu0 %v9172_v0  ;;  %v9250_v35 = vpack.c.bf16 %v4424_v3, %v4417_v2  ;;  %v4418_v38 = vsub.f32 %v9234_v29, %v4417_v2  ;;  %v4425_v11 = vsub.f32 %v9239_v33, %v4424_v3  ;;  %v4465_v3 = vsub.f32 %v9148_v53, %v4311_v56 }
 0x4ff   :  { %v4480_v56 = vand.u32 4294901760, %v4479_v52 }
 0x500   :  { %7982 = vmatpush3.bf16.msra.mxu1 %v9172_v0  ;;  %v4426_v21 = vand.u32 4294901760, %v4425_v11 }
 0x501   :  { %7886 = vmatpush3.bf16.msra.mxu0 %v9172_v0  ;;  %7984 = vmatprep.subr.bf16.mxu1 %v9190_v4 }
 0x502   :  { %7888 = vmatprep.subr.bf16.mxu0 %v9208_v23 }
 0x514   :  { %v4179_v54 = vpop.xlane.xlu0 %4178 }
 0x515   :  { %v4181_v6 = vmax.f32 %v4179_v54, 1e-24  ;;  %v4176_v58 = vpop.xlane.xlu1 %4175 }
 0x516   :  { %v4180_v60 = vmax.f32 %v4176_v58, 1e-24  ;;  %v4411_v58 = vsub.f32 %v9223_v10, %v4410_v32 }
 0x517   :  { %8584 = vrsqrt.f32 %v4181_v6  ;;  %v9243_v6 = vpack.c.bf16 %v4410_v32, %v4403_v28  ;;  %v4452_v32 = vand.u32 4294901760, %v4451_v9 }
 0x518   :  { %8586 = vrsqrt.f32 %v4180_v60  ;;  %v4405_v60 = vand.u32 4294901760, %v4404_v40  ;;  %v4412_v20 = vand.u32 4294901760, %v4411_v58  ;;  %v8596_v40 = vld [vmem:[#allocation2 + $0x38] sm:$0xff]  ;;  %v1113_v1 = vpop.xlane.xlu0 %1112 }
 0x519   :  { %v4453_v47 = vsub.f32 %v4451_v9, %v4452_v32 }
 0x51a   :  { %v9257_v16 = vpack.c.bf16 %v4412_v20, %v4405_v60  ;;  %v8597_v60 = vld [vmem:[#allocation2 + $0x30] sm:$0xff] }
 0x51b   :  { %v4454_v20 = vand.u32 4294901760, %v4453_v47  ;;  %v1110_v47 = vpop.xlane.xlu1 %1109 }
 0x521   :  { %v8585_v19 = vpop.eup %8584 }
 0x522   :  { %v8587_v24 = vpop.eup %8586  ;;  %v4185_v25 = vmul.f32 %v8585_v19, %v9029_v57  ;;  %v4391_v57 = vand.u32 4294901760, %v4390_v22  ;;  %v4419_v19 = vand.u32 4294901760, %v4418_v38  ;;  %v4438_v22 = vand.u32 4294901760, %v4437_v18 }
 0x523   :  { %v4184_v27 = vmul.f32 %v8587_v24, %v9033_v59  ;;  %v4398_v59 = vand.u32 4294901760, %v4397_v8  ;;  %v4431_v24 = vand.u32 4294901760, %v4430_v15  ;;  %v4466_v38 = vand.u32 4294901760, %v4465_v3 }
 0x524   :  { %4206 = vrot.lane.b32.xlu1 %v4185_v25, %s8728_s18  ;;  %v8594_v25 = vld [vmem:[#allocation2 + $0x28] sm:$0xff]  ;;  %v9264_v8 = vpack.c.bf16 %v4426_v21, %v4419_v19  ;;  %v4439_v43 = vsub.f32 %v4437_v18, %v4438_v22  ;;  %v4472_v21 = vsub.f32 %v9158_v7, %v4314_v13  ;;  %v9308_v13 = vpack.c.bf16 %v9202_v14, %v9197_v12 }
 0x525   :  { %4204 = vrot.lane.b32.xlu0 %v4184_v27, %s8728_s18  ;;  %v9241_v54 = vpack.c.bf16 %v4398_v59, %v4391_v57  ;;  %v8595_v27 = vld [vmem:[#allocation2 + $0x20] sm:$0xff]  ;;  %v4432_v57 = vsub.f32 %v4430_v15, %v4431_v24  ;;  %v9272_v42 = vpack.c.bf16 %v4438_v22, %v4431_v24  ;;  %v4445_v59 = vand.u32 4294901760, %v4444_v39 }
 0x526   :  { %v4440_v58 = vand.u32 4294901760, %v4439_v43  ;;  %v4467_v24 = vsub.f32 %v4465_v3, %v4466_v38  ;;  %v4473_v53 = vand.u32 4294901760, %v4472_v21  ;;  %v4481_v43 = vsub.f32 %v4479_v52, %v4480_v56 }
 0x527   :  { %v4433_v28 = vand.u32 4294901760, %v4432_v57  ;;  %v9276_v2 = vpack.c.bf16 %v4452_v32, %v4445_v59  ;;  %v4446_v44 = vsub.f32 %v4444_v39, %v4445_v59  ;;  %v9324_v63 = vpack.c.bf16 %v4479_v52, %v4472_v21 }
 0x528   :  { %4222 = vrot.lane.b32.xlu1 %v8592_v5, %s8726_s6  ;;  %v4468_v22 = vand.u32 4294901760, %v4467_v24  ;;  %v4474_v57 = vsub.f32 %v4472_v21, %v4473_v53  ;;  %v4482_v32 = vand.u32 4294901760, %v4481_v43  ;;  %v1115_v12 = vmax.f32 %v1113_v1, 1e-24 }
 0x529   :  { %4220 = vrot.lane.b32.xlu0 %v8593_v37, %s8726_s6  ;;  %v9281_v48 = vpack.c.bf16 %v4440_v58, %v4433_v28  ;;  %v4447_v5 = vand.u32 4294901760, %v4446_v44  ;;  %v4459_v37 = vand.u32 4294901760, %v4458_v45  ;;  %v9318_v58 = vpack.c.bf16 %v4437_v18, %v4430_v15 }
 0x52a   :  { %v4475_v59 = vand.u32 4294901760, %v4474_v57  ;;  %v9322_v44 = vpack.c.bf16 %v4465_v3, %v4458_v45  ;;  %v1114_v14 = vmax.f32 %v1110_v47, 1e-24  ;;  %8588 = vrsqrt.f32 %v1115_v12 }
 0x52b   :  { %v9286_v11 = vpack.c.bf16 %v4454_v20, %v4447_v5  ;;  %v4460_v19 = vsub.f32 %v4458_v45, %v4459_v37  ;;  %v9294_v55 = vpack.c.bf16 %v4466_v38, %v4459_v37 }
 0x52c   :  { %4230 = vrot.lane.b32.xlu1 %v8594_v25, %s8727_s17  ;;  %v9300_v7 = vpack.c.bf16 %v4482_v32, %v4475_v59  ;;  %8590 = vrsqrt.f32 %v1114_v14  ;;  %v4975_v14 = vld [vmem:[#allocation7 + $0x70] sm:$0xff] }
 0x52d   :  { %4228 = vrot.lane.b32.xlu0 %v8595_v27, %s8727_s17  ;;  %v4461_v25 = vand.u32 4294901760, %v4460_v19  ;;  %v9296_v27 = vpack.c.bf16 %v4480_v56, %v4473_v53 }
 0x52f   :  { %v9298_v28 = vpack.c.bf16 %v4468_v22, %v4461_v25 }
 0x530   :  { %4238 = vrot.lane.b32.xlu1 %v8596_v40, %s8728_s18  ;;  %v9316_v40 = vpack.c.bf16 %v9239_v33, %v9234_v29 }
 0x531   :  { %4236 = vrot.lane.b32.xlu0 %v8597_v60, %s8728_s18  ;;  %v9320_v60 = vpack.c.bf16 %v4451_v9, %v4444_v39 }
 0x534   :  { %v8589_v5 = vpop.eup %8588 }
 0x535   :  { %v1119_v15 = vmul.f32 %v8589_v5, %v9012_v50 }
 0x536   :  { %v8591_v20 = vpop.eup %8590 }
 0x537   :  { %v1118_v18 = vmul.f32 %v8591_v20, %v9014_v51 }
 0x53e   :  { %v4191_v29 = vpop.permute.xlu0 %4190 }
 0x53f   :  { %v4189_v26 = vpop.permute.xlu1 %4188  ;;  %v4211_v39 = vsel %vm102_vm0, %v1119_v15, %v4191_v29 }
 0x540   :  { %v4210_v9 = vsel %vm102_vm0, %v1118_v18, %v4189_v26  ;;  %v4976_v26 = vld [vmem:[#allocation7 + $0x78] sm:$0xff] }
 0x541   :  { %v5030_v5 = vand.u32 4294901760, %v4976_v26 }
 0x56a   :  { %v4199_v10 = vpop.permute.xlu1 %4198 }
 0x56b   :  { %v4214_v45 = vsel %vm4212_vm4, %v4211_v39, %v4199_v10  ;;  %v5027_v10 = vand.u32 4294901760, %v4975_v14 }
 0x56e   :  { %v4197_v33 = vpop.permute.xlu1 %4196 }
 0x56f   :  { %v4213_v37 = vsel %vm4212_vm4, %v4210_v9, %v4197_v33  ;;  %v9451_v33 = vpack.c.bf16 %v5030_v5, %v5027_v10 }
 0x596   :  { %v4207_v3 = vpop.permute.xlu1 %4206 }
 0x597   :  { %v4217_v38 = vsel %vm4215_vm5, %v4214_v45, %v4207_v3  ;;  %v4205_v19 = vpop.permute.xlu0 %4204 }
 0x598   :  { %v9333_v21 = vand.u32 4294901760, %v4217_v38  ;;  %v4216_v50 = vsel %vm4215_vm5, %v4213_v37, %v4205_v19 }
 0x599   :  { %v4352_v52 = vand.u32 4294901760, %v4216_v50 }
 0x59a   :  { %v9337_v51 = vsub.f32 %v4217_v38, %v9333_v21 }
 0x59b   :  { %v4353_v24 = vsub.f32 %v4216_v50, %v4352_v52 }
 0x59c   :  { %v4364_v25 = vand.u32 4294901760, %v9337_v51 }
 0x59d   :  { %v4354_v53 = vand.u32 4294901760, %v4353_v24 }
 0x59e   :  { %v4365_v56 = vsub.f32 %v9337_v51, %v4364_v25 }
 0x59f   :  { %7290 = vmatprep.mubr.f32.mxu1 %v4354_v53  ;;  %v4355_v22 = vsub.f32 %v4353_v24, %v4354_v53 }
 0x5a0   :  { %7291 = vmatmul.mubr.f32.vlgmr.msra.gmra.mrb[8].mxu1 %v4364_v25  ;;  %v4366_v43 = vand.u32 4294901760, %v4365_v56 }
 0x5a1   :  { %7986 = vmatpush3.bf16.msra.mxu1 %v9190_v4  ;;  %7325 = vmatprep.mubr.f32.mxu1 %v4352_v52  ;;  %v4356_v57 = vand.u32 4294901760, %v4355_v22  ;;  %v9403_v4 = vld [vmem:[#allocation7 + $0x18] sm:$0xff] }
 0x5a2   :  { %7988 = vmatprep.subr.bf16.mxu1 %v9217_v30 }
 0x5a3   :  { %7185 = vmatprep.mubr.f32.mxu0 %v4356_v57 }
 0x5a4   :  { %7186 = vmatmul.mubr.f32.vlgmr.msra.gmra.mrb[8].mxu0 %v4366_v43 }
 0x5a5   :  { %7890 = vmatpush3.bf16.msra.mxu0 %v9208_v23  ;;  %7990 = vmatpush3.bf16.msra.mxu1 %v9217_v30  ;;  %v4994_v23 = vand.u32 4294901760, %v9403_v4 }
 0x5a6   :  { %7220 = vmatprep.mubr.f32.mxu0 %v4352_v52  ;;  %7892 = vmatprep.subr.bf16.mxu0 %v9241_v54 }
 0x5a7   :  { %7992 = vmatprep.subr.bf16.mxu1 %v9243_v6 }
 0x5a9   :  { %7894 = vmatpush3.bf16.msra.mxu0 %v9241_v54  ;;  %7994 = vmatpush3.bf16.msra.mxu1 %v9243_v6  ;;  %v4966_v54 = vld [vmem:[#allocation7 + $0x28] sm:$0xff] }
 0x5aa   :  { %7896 = vmatprep.subr.bf16.mxu0 %v9257_v16  ;;  %7996 = vmatprep.subr.bf16.mxu1 %v9250_v35 }
 0x5ad   :  { %7898 = vmatpush3.bf16.msra.mxu0 %v9257_v16  ;;  %7998 = vmatpush3.bf16.msra.mxu1 %v9250_v35  ;;  %v5000_v35 = vand.u32 4294901760, %v4966_v54 }
 0x5ae   :  { %7900 = vmatprep.subr.bf16.mxu0 %v9264_v8  ;;  %8000 = vmatprep.subr.bf16.mxu1 %v9272_v42 }
 0x5af   :  { %v9465_v37 = vsub.f32 %v4966_v54, %v5000_v35 }
 0x5b1   :  { %7902 = vmatpush3.bf16.msra.mxu0 %v9264_v8  ;;  %8002 = vmatpush3.bf16.msra.mxu1 %v9272_v42  ;;  %v4967_v8 = vld [vmem:[#allocation7 + $0x30] sm:$0xff]  ;;  %v4968_v42 = vld [vmem:[#allocation7 + $0x38] sm:$0xff]  ;;  %v10105_v19 = vand.u32 4294901760, %v9465_v37 }
 0x5b2   :  { %7904 = vmatprep.subr.bf16.mxu0 %v9281_v48  ;;  %8004 = vmatprep.subr.bf16.mxu1 %v9276_v2 }
 0x5b3   :  { %v5124_v50 = vsub.f32 %v9465_v37, %v10105_v19 }
 0x5b5   :  { %7906 = vmatpush3.bf16.msra.mxu0 %v9281_v48  ;;  %8006 = vmatpush3.bf16.msra.mxu1 %v9276_v2  ;;  %v5003_v2 = vand.u32 4294901760, %v4967_v8  ;;  %v5006_v48 = vand.u32 4294901760, %v4968_v42  ;;  %v5125_v25 = vand.u32 4294901760, %v5124_v50 }
 0x5b6   :  { %7908 = vmatprep.subr.bf16.mxu0 %v9286_v11  ;;  %8008 = vmatprep.subr.bf16.mxu1 %v9294_v55 }
 0x5b9   :  { %7910 = vmatpush3.bf16.msra.mxu0 %v9286_v11  ;;  %8010 = vmatpush3.bf16.msra.mxu1 %v9294_v55  ;;  %v9429_v11 = vpack.c.bf16 %v5006_v48, %v5003_v2  ;;  %v4969_v55 = vld [vmem:[#allocation7 + $0x40] sm:$0xff] }
 0x5ba   :  { %7912 = vmatprep.subr.bf16.mxu0 %v9298_v28  ;;  %8012 = vmatprep.subr.bf16.mxu1 %v9296_v27 }
 0x5bd   :  { %7914 = vmatpush3.bf16.msra.mxu0 %v9298_v28  ;;  %8014 = vmatpush3.bf16.msra.mxu1 %v9296_v27  ;;  %v4970_v27 = vld [vmem:[#allocation7 + $0x48] sm:$0xff]  ;;  %v5009_v28 = vand.u32 4294901760, %v4969_v55 }
 0x5be   :  { %7916 = vmatprep.subr.bf16.mxu0 %v9300_v7  ;;  %8016 = vmatprep.subr.bf16.mxu1 %v9067_v31  ;;  %v5012_v59 = vand.u32 4294901760, %v4970_v27 }
 0x5c0   :  { %7326 = vmatmul.mubr.f32.vlgmr.msra.gmra.mrb[8].mxu1 %v9333_v21  ;;  %v9433_v32 = vpack.c.bf16 %v5012_v59, %v5009_v28 }
 0x5c1   :  { %7918 = vmatpush3.bf16.msra.mxu0 %v9300_v7  ;;  %8018 = vmatpush3.bf16.msra.mxu1 %v9067_v31  ;;  %v4961_v31 = vld [vmem:[#allocation7] sm:$0xff]  ;;  %v4971_v7 = vld [vmem:[#allocation7 + $0x50] sm:$0xff] }
 0x5c2   :  { %7360 = vmatprep.mubr.f32.mxu1 %v4352_v52  ;;  %7920 = vmatprep.subr.bf16.mxu0 %v9304_v62  ;;  %v9476_v52 = vsub.f32 %v4967_v8, %v5003_v2 }
 0x5c3   :  { %8020 = vmatprep.subr.bf16.mxu1 %v9075_v34 }
 0x5c4   :  { %7221 = vmatmul.mubr.f32.vlgmr.msra.gmra.mrb[8].mxu0 %v9333_v21  ;;  %v10104_v53 = vand.u32 4294901760, %v9476_v52 }
 0x5c5   :  { %7922 = vmatpush3.bf16.msra.mxu0 %v9304_v62  ;;  %7255 = vmatprep.mubr.f32.mxu0 %v4353_v24  ;;  %v4972_v62 = vld [vmem:[#allocation7 + $0x58] sm:$0xff] }
 0x5c6   :  { %8022 = vmatpush3.bf16.msra.mxu1 %v9075_v34  ;;  %7924 = vmatprep.subr.bf16.mxu0 %v9308_v13  ;;  %v4962_v34 = vld [vmem:[#allocation7 + $0x8] sm:$0xff]  ;;  %v5131_v57 = vsub.f32 %v9476_v52, %v10104_v53 }
 0x5c7   :  { %8024 = vmatprep.subr.bf16.mxu1 %v9091_v36 }
 0x5c9   :  { %7926 = vmatpush3.bf16.msra.mxu0 %v9308_v13  ;;  %v5015_v13 = vand.u32 4294901760, %v4971_v7 }
 0x5ca   :  { %8026 = vmatpush3.bf16.msra.mxu1 %v9091_v36  ;;  %7928 = vmatprep.subr.bf16.mxu0 %v9312_v17  ;;  %v4985_v36 = vand.u32 4294901760, %v4961_v31 }
 0x5cb   :  { %8028 = vmatprep.subr.bf16.mxu1 %v9109_v41  ;;  %v9501_v8 = vsub.f32 %v4971_v7, %v5015_v13 }
 0x5cc   :  { %v9443_v47 = vsub.f32 %v4961_v31, %v4985_v36  ;;  %v9490_v31 = vsub.f32 %v4969_v55, %v5009_v28 }
 0x5cd   :  { %7930 = vmatpush3.bf16.msra.mxu0 %v9312_v17  ;;  %v5018_v17 = vand.u32 4294901760, %v4972_v62  ;;  %v10100_v55 = vand.u32 4294901760, %v9501_v8 }
 0x5ce   :  { %8030 = vmatpush3.bf16.msra.mxu1 %v9109_v41  ;;  %7932 = vmatprep.subr.bf16.mxu0 %v9316_v40  ;;  %v4988_v41 = vand.u32 4294901760, %v4962_v34  ;;  %v5088_v20 = vand.u32 4294901760, %v9443_v47 }
 0x5cf   :  { %8032 = vmatprep.subr.bf16.mxu1 %v9126_v46 }
 0x5d0   :  { %v9445_v12 = vsub.f32 %v4962_v34, %v4988_v41  ;;  %v5089_v15 = vsub.f32 %v9443_v47, %v5088_v20  ;;  %v9492_v34 = vsub.f32 %v4970_v27, %v5012_v59  ;;  %v5159_v59 = vsub.f32 %v9501_v8, %v10100_v55 }
 0x5d1   :  { %7934 = vmatpush3.bf16.msra.mxu0 %v9316_v40  ;;  %v9437_v40 = vpack.c.bf16 %v5018_v17, %v5015_v13 }
 0x5d2   :  { %8034 = vmatpush3.bf16.msra.mxu1 %v9126_v46  ;;  %7936 = vmatprep.subr.bf16.mxu0 %v9318_v58  ;;  %v9401_v46 = vld [vmem:[#allocation7 + $0x10] sm:$0xff]  ;;  %v5095_v29 = vand.u32 4294901760, %v9445_v12  ;;  %v5090_v39 = vand.u32 4294901760, %v5089_v15  ;;  %v10101_v54 = vand.u32 4294901760, %v9492_v34  ;;  %v5160_v15 = vand.u32 4294901760, %v5159_v59 }
 0x5d3   :  { %8036 = vmatprep.subr.bf16.mxu1 %v9138_v49 }
 0x5d4   :  { %v5096_v18 = vsub.f32 %v9445_v12, %v5095_v29  ;;  %v5152_v2 = vsub.f32 %v9492_v34, %v10101_v54 }
 0x5d5   :  { %7938 = vmatpush3.bf16.msra.mxu0 %v9318_v58  ;;  %v4973_v58 = vld [vmem:[#allocation7 + $0x60] sm:$0xff] }
 0x5d6   :  { %8038 = vmatpush3.bf16.msra.mxu1 %v9138_v49  ;;  %7940 = vmatprep.subr.bf16.mxu0 %v9320_v60  ;;  %v9408_v49 = vpack.c.bf16 %v4988_v41, %v4985_v36  ;;  %v5097_v9 = vand.u32 4294901760, %v5096_v18  ;;  %v5132_v36 = vand.u32 4294901760, %v5131_v57  ;;  %v5153_v28 = vand.u32 4294901760, %v5152_v2 }
 0x5d7   :  { %8040 = vmatprep.subr.bf16.mxu1 %v9156_v61 }
 0x5d8   :  { %v9461_v45 = vpack.c.bf16 %v5097_v9, %v5090_v39 }
 0x5d9   :  { %7942 = vmatpush3.bf16.msra.mxu0 %v9320_v60  ;;  %v4974_v60 = vld [vmem:[#allocation7 + $0x68] sm:$0xff] }
 0x5da   :  { %8042 = vmatpush3.bf16.msra.mxu1 %v9156_v61  ;;  %7944 = vmatprep.subr.bf16.mxu0 %v9322_v44  ;;  %v4991_v61 = vand.u32 4294901760, %v9401_v46 }
 0x5db   :  { %8044 = vmatprep.subr.bf16.mxu1 %v9172_v0 }
 0x5dc   :  { %v9419_v30 = vpack.c.bf16 %v4994_v23, %v4991_v61  ;;  %v9585_v19 = vsub.f32 %v9401_v46, %v4991_v61 }
 0x5dd   :  { %7946 = vmatpush3.bf16.msra.mxu0 %v9322_v44  ;;  %v5021_v44 = vand.u32 4294901760, %v4973_v58 }
 0x5de   :  { %8046 = vmatpush3.bf16.msra.mxu1 %v9172_v0  ;;  %7948 = vmatprep.subr.bf16.mxu0 %v9324_v63  ;;  %v4965_v0 = vld [vmem:[#allocation7 + $0x20] sm:$0xff]  ;;  %v5102_v46 = vand.u32 4294901760, %v9585_v19 }
 0x5df   :  { %v4997_v6 = vand.u32 4294901760, %v4965_v0 }
 0x5e1   :  { %7361 = vmatmul.mubr.f32.vlgmr.msra.gmra.mrb[8].mxu1 %v9333_v21  ;;  %7950 = vmatpush3.bf16.msra.mxu0 %v9324_v63  ;;  %v9425_v16 = vpack.c.bf16 %v5000_v35, %v4997_v6  ;;  %v5024_v63 = vand.u32 4294901760, %v4974_v60  ;;  %v9463_v3 = vsub.f32 %v4965_v0, %v4997_v6  ;;  %v10102_v0 = vand.u32 4294901760, %v9490_v31 }
 0x5e2   :  { %8048 = vmatprep.subr.bf16.mxu0 %v9408_v49 }
 0x5e3   :  { %v9441_v1 = vpack.c.bf16 %v5024_v63, %v5021_v44  ;;  %v5116_v38 = vand.u32 4294901760, %v9463_v3  ;;  %v5145_v35 = vsub.f32 %v9490_v31, %v10102_v0  ;;  %v9518_v13 = vsub.f32 %v4974_v60, %v5024_v63 }
 0x5e4   :  { %7256 = vmatmul.mubr.f32.vlgmr.msra.gmra.mrb[8].mxu0 %v9337_v51  ;;  %v9478_v51 = vsub.f32 %v4968_v42, %v5006_v48  ;;  %v9503_v42 = vsub.f32 %v4972_v62, %v5018_v17  ;;  %v9516_v62 = vsub.f32 %v4973_v58, %v5021_v44  ;;  %v9532_v60 = vsub.f32 %v4975_v14, %v5027_v10 }
 0x5e5   :  { %8050 = vmatpush3.bf16.msra.mxu0 %v9408_v49  ;;  %v5117_v21 = vsub.f32 %v9463_v3, %v5116_v38  ;;  %v5146_v48 = vand.u32 4294901760, %v5145_v35  ;;  %v10097_v9 = vand.u32 4294901760, %v9518_v13  ;;  %v9534_v44 = vsub.f32 %v4976_v26, %v5030_v5 }
 0x5e6   :  { %8052 = vmatprep.subr.bf16.mxu0 %v9419_v30  ;;  %v10103_v56 = vand.u32 4294901760, %v9478_v51  ;;  %v10099_v27 = vand.u32 4294901760, %v9503_v42  ;;  %v10098_v39 = vand.u32 4294901760, %v9516_v62  ;;  %v9550_v5 = vpack.c.bf16 %v9445_v12, %v9443_v47 }
 0x5e7   :  { %v5118_v24 = vand.u32 4294901760, %v5117_v21  ;;  %v9520_v17 = vpack.c.bf16 %v5153_v28, %v5146_v48  ;;  %v5180_v58 = vsub.f32 %v9518_v13, %v10097_v9  ;;  %v10095_v57 = vand.u32 4294901760, %v9534_v44 }
 0x5e8   :  { %v5138_v43 = vsub.f32 %v9478_v51, %v10103_v56  ;;  %v5166_v7 = vsub.f32 %v9503_v42, %v10099_v27  ;;  %v5173_v50 = vsub.f32 %v9516_v62, %v10098_v39  ;;  %v9554_v35 = vpack.c.bf16 %v9465_v37, %v9463_v3  ;;  %v8599_v27 = vld [vmem:[#allocation2] sm:$0xff] }
 0x5e9   :  { %8054 = vmatpush3.bf16.msra.mxu0 %v9419_v30  ;;  %v9482_v22 = vpack.c.bf16 %v5125_v25, %v5118_v24  ;;  %v5181_v24 = vand.u32 4294901760, %v5180_v58  ;;  %v10096_v25 = vand.u32 4294901760, %v9532_v60  ;;  %v9558_v2 = vpack.c.bf16 %v9478_v51, %v9476_v52 }
 0x5ea   :  { %8056 = vmatprep.subr.bf16.mxu0 %v9425_v16  ;;  %v5139_v41 = vand.u32 4294901760, %v5138_v43  ;;  %v5167_v18 = vand.u32 4294901760, %v5166_v7  ;;  %v5174_v63 = vand.u32 4294901760, %v5173_v50  ;;  %v9562_v48 = vpack.c.bf16 %v9492_v34, %v9490_v31 }
 0x5eb   :  { %v9566_v28 = vpack.c.bf16 %v9503_v42, %v9501_v8  ;;  %v9570_v59 = vpack.c.bf16 %v9518_v13, %v9516_v62  ;;  %v9574_v7 = vpack.c.bf16 %v9534_v44, %v9532_v60  ;;  %v10113_v47 = vand.u32 4294901760, %v9465_v37 }
 0x5ec   :  { %v9496_v6 = vpack.c.bf16 %v5139_v41, %v5132_v36  ;;  %v9524_v21 = vpack.c.bf16 %v5167_v18, %v5160_v15  ;;  %v9538_v43 = vpack.c.bf16 %v5181_v24, %v5174_v63  ;;  %v5187_v36 = vsub.f32 %v9532_v60, %v10096_v25  ;;  %v4223_v15 = vpop.permute.xlu1 %4222  ;;  %v4221_v18 = vpop.permute.xlu0 %4220  ;;  %v6394_v63 = vld [vmem:[%s10089_s3] ss:$0 sm:$0xff] }
 0x5ed   :  { %8058 = vmatpush3.bf16.msra.mxu0 %v9425_v16  ;;  %v5194_v41 = vsub.f32 %v9534_v44, %v10095_v57  ;;  %v8598_v57 = vld [vmem:[#allocation2 + $0x8] sm:$0xff]  ;;  %v4242_v55 = vsel %vm102_vm0, %v8599_v27, %v4221_v18  ;;  %v8183_v12 = vpack.c.bf16 %v10113_v47, %v5116_v38  ;;  %v10118_v3 = vand.u32 4294901760, %v9501_v8 }
 0x5ee   :  { %8060 = vmatprep.subr.bf16.mxu0 %v9429_v11  ;;  %v5188_v14 = vand.u32 4294901760, %v5187_v36  ;;  %v4243_v25 = vsel %vm102_vm0, %v8598_v57, %v4223_v15  ;;  %v10119_v37 = vand.u32 4294901760, %v9503_v42  ;;  %v5683_v42 = vld [vmem:[#allocation9 + $0x58] sm:$0xff] }
 0x5ef   :  { %v5195_v10 = vand.u32 4294901760, %v5194_v41 }
 0x5f0   :  { %v4231_v24 = vpop.permute.xlu1 %4230  ;;  %v4229_v41 = vpop.permute.xlu0 %4228  ;;  %v8195_v38 = vpack.c.bf16 %v10119_v37, %v10118_v3 }
 0x5f1   :  { %8062 = vmatpush3.bf16.msra.mxu0 %v9429_v11  ;;  %v9546_v26 = vpack.c.bf16 %v5195_v10, %v5188_v14  ;;  %v4245_v56 = vsel %vm4212_vm4, %v4243_v25, %v4231_v24  ;;  %v4244_v15 = vsel %vm4212_vm4, %v4242_v55, %v4229_v41 }
 0x5f2   :  { %8064 = vmatprep.subr.bf16.mxu0 %v9433_v32 }
 0x5f4   :  { %v4239_v53 = vpop.permute.xlu1 %4238 }
 0x5f5   :  { %8066 = vmatpush3.bf16.msra.mxu0 %v9433_v32  ;;  %v4247_v18 = vsel %vm4215_vm5, %v4245_v56, %v4239_v53  ;;  %v5103_v53 = vsub.f32 %v9585_v19, %v5102_v46 }
 0x5f6   :  { %8068 = vmatprep.subr.bf16.mxu0 %v9437_v40 }
 0x5f7   :  { %v5104_v41 = vand.u32 4294901760, %v5103_v53 }
 0x5f9   :  { %8070 = vmatpush3.bf16.msra.mxu0 %v9437_v40 }
 0x5fa   :  { %8072 = vmatprep.subr.bf16.mxu0 %v9441_v1 }
 0x5fd   :  { %8074 = vmatpush3.bf16.msra.mxu0 %v9441_v1 }
 0x5fe   :  { %8076 = vmatprep.subr.bf16.mxu0 %v9451_v33 }
 0x601   :  { %8078 = vmatpush3.bf16.msra.mxu0 %v9451_v33 }
 0x602   :  { %8080 = vmatprep.subr.bf16.mxu0 %v9461_v45 }
 0x6b4   :  { %v7362_v50 = vpop.f32.mrb[8].mxu1 }
 0x6b5   :  { %v4945_v58 = vpop.f32.mrb[9].mxu1 }
 0x6b7   :  { %v7257_v36 = vpop.f32.mrb[8].mxu0 }
 0x6b8   :  { %v8431_v14 = vadd.f32 %v7257_v36, %v6394_v63  ;;  %v4629_v10 = vpop.f32.mrb[9].mxu0  ;;  %v9590_v36 = vsub.f32 %v9403_v4, %v4994_v23 }
 0x6b9   :  { %v8433_v9 = vadd.f32 %v6394_v63, %v4629_v10 }
 0x6ba   :  { %v8432_v39 = vadd.f32 %v8431_v14, %v7362_v50  ;;  %v4237_v50 = vpop.permute.xlu0 %4236  ;;  %v5109_v61 = vand.u32 4294901760, %v9590_v36 }
 0x6bb   :  { %v8434_v54 = vadd.f32 %v8433_v9, %v4945_v58  ;;  %v4246_v58 = vsel %vm4215_vm5, %v4244_v15, %v4237_v50 }
 0x6bc   :  { %v4956_v0 = vmul.f32 0.01, %v8432_v39  ;;  %v5110_v56 = vsub.f32 %v9590_v36, %v5109_v61 }
 0x6bd   :  { %v4955_v57 = vmul.f32 0.01, %v8434_v54 }
 0x6be   :  { %v4958_v27 = vmax.f32 %v8432_v39, %v4956_v0  ;;  %v5111_v14 = vand.u32 4294901760, %v5110_v56 }
 0x6bf   :  { %v4957_v9 = vmax.f32 %v8434_v54, %v4955_v57 }
 0x6c0   :  { %v9594_v25 = vadd.f32 %v4958_v27, %v4247_v18  ;;  %v8083_v50 = vpack.c.bf16 %v5111_v14, %v5104_v41  ;;  %v9662_v18 = vld [vmem:[#allocation9 + $0x28] sm:$0xff]  ;;  %v9679_v41 = vld [vmem:[#allocation9 + $0x30] sm:$0xff]  ;;  %v9681_v14 = vld [vmem:[#allocation9 + $0x38] sm:$0xff] }
 0x6c1   :  { %v9599_v63 = vadd.f32 %v4957_v9, %v4246_v58  ;;  %v9660_v9 = vld [vmem:[#allocation9 + $0x20] sm:$0xff]  ;;  %v5711_v56 = vand.u32 4294901760, %v9662_v18 }
 0x6c2   :  { %v9602_v4 = vand.u32 4294901760, %v9594_v25  ;;  %v5708_v53 = vand.u32 4294901760, %v9660_v9 }
 0x6c3   :  { %v9605_v23 = vand.u32 4294901760, %v9599_v63 }
 0x6c4   :  { %v9609_v0 = vsub.f32 %v9594_v25, %v9602_v4 }
 0x6c5   :  { %v9619_v54 = vsub.f32 %v9599_v63, %v9605_v23 }
 0x6c6   :  { %v5077_v55 = vand.u32 4294901760, %v9609_v0 }
 0x6c7   :  { %v5067_v39 = vand.u32 4294901760, %v9619_v54 }
 0x6c8   :  { %v5078_v24 = vsub.f32 %v9609_v0, %v5077_v55 }
 0x6c9   :  { %v5068_v10 = vsub.f32 %v9619_v54, %v5067_v39 }
 0x6ca   :  { %v5079_v15 = vand.u32 4294901760, %v5078_v24 }
 0x6cb   :  { %v5069_v57 = vand.u32 4294901760, %v5068_v10  ;;  %v9691_v10 = vpack.c.bf16 %v5711_v56, %v5708_v53 }
 0x6cd   :  { %7395 = vmatprep.mubr.f32.mxu0 %v5069_v57  ;;  %v5714_v57 = vand.u32 4294901760, %v9679_v41 }
 0x6ce   :  { %7396 = vmatmul.mubr.f32.vlgmr.msra.gmra.mrb[10].mxu0 %v5079_v15  ;;  %v5717_v15 = vand.u32 4294901760, %v9681_v14 }
 0x6cf   :  { %8082 = vmatpush3.bf16.msra.mxu0 %v9461_v45  ;;  %7430 = vmatprep.mubr.f32.mxu0 %v9605_v23  ;;  %v8115_v45 = vpack.c.bf16 %v9590_v36, %v9585_v19 }
 0x6d0   :  { %8084 = vmatprep.subr.bf16.mxu0 %v8083_v50 }
 0x6d3   :  { %8086 = vmatpush3.bf16.msra.mxu0 %v8083_v50  ;;  %v9703_v50 = vpack.c.bf16 %v5717_v15, %v5714_v57 }
 0x6d4   :  { %8088 = vmatprep.subr.bf16.mxu0 %v9482_v22 }
 0x6d7   :  { %8090 = vmatpush3.bf16.msra.mxu0 %v9482_v22  ;;  %v9647_v22 = vld [vmem:[#allocation9] sm:$0xff] }
 0x6d8   :  { %8092 = vmatprep.subr.bf16.mxu0 %v9496_v6 }
 0x6db   :  { %8094 = vmatpush3.bf16.msra.mxu0 %v9496_v6  ;;  %v9649_v6 = vld [vmem:[#allocation9 + $0x8] sm:$0xff] }
 0x6dc   :  { %8096 = vmatprep.subr.bf16.mxu0 %v9520_v17 }
 0x6df   :  { %8098 = vmatpush3.bf16.msra.mxu0 %v9520_v17  ;;  %v9651_v17 = vld [vmem:[#allocation9 + $0x10] sm:$0xff] }
 0x6e0   :  { %8100 = vmatprep.subr.bf16.mxu0 %v9524_v21  ;;  %v5702_v27 = vand.u32 4294901760, %v9651_v17 }
 0x6e3   :  { %8102 = vmatpush3.bf16.msra.mxu0 %v9524_v21  ;;  %v5696_v21 = vand.u32 4294901760, %v9647_v22 }
 0x6e4   :  { %8104 = vmatprep.subr.bf16.mxu0 %v9538_v43 }
 0x6e7   :  { %8106 = vmatpush3.bf16.msra.mxu0 %v9538_v43  ;;  %v5699_v43 = vand.u32 4294901760, %v9649_v6 }
 0x6e8   :  { %8108 = vmatprep.subr.bf16.mxu0 %v9546_v26 }
 0x6eb   :  { %8110 = vmatpush3.bf16.msra.mxu0 %v9546_v26  ;;  %v9657_v26 = vld [vmem:[#allocation9 + $0x18] sm:$0xff] }
 0x6ec   :  { %8112 = vmatprep.subr.bf16.mxu0 %v9550_v5  ;;  %v5705_v58 = vand.u32 4294901760, %v9657_v26 }
 0x6ee   :  { %7431 = vmatmul.mubr.f32.vlgmr.msra.gmra.mrb[10].mxu0 %v9602_v4  ;;  %v9677_v24 = vpack.c.bf16 %v5705_v58, %v5702_v27 }
 0x6ef   :  { %8114 = vmatpush3.bf16.msra.mxu0 %v9550_v5  ;;  %7465 = vmatprep.mubr.f32.mxu0 %v9619_v54  ;;  %v9669_v5 = vpack.c.bf16 %v5699_v43, %v5696_v21 }
 0x6f0   :  { %8116 = vmatprep.subr.bf16.mxu0 %v8115_v45 }
 0x6f1   :  { %8240 = vmatprep.subr.bf16.mxu1 %v9669_v5 }
 0x6f2   :  { %8242 = vmatpush3.bf16.msra.mxu1 %v9669_v5 }
 0x6f3   :  { %8118 = vmatpush3.bf16.msra.mxu0 %v8115_v45  ;;  %8244 = vmatprep.subr.bf16.mxu1 %v9677_v24 }
 0x6f4   :  { %8120 = vmatprep.subr.bf16.mxu0 %v9554_v35 }
 0x6f6   :  { %8246 = vmatpush3.bf16.msra.mxu1 %v9677_v24 }
 0x6f7   :  { %8122 = vmatpush3.bf16.msra.mxu0 %v9554_v35  ;;  %8248 = vmatprep.subr.bf16.mxu1 %v9691_v10  ;;  %v8175_v35 = vpack.c.bf16 %v5095_v29, %v5088_v20  ;;  %v10114_v20 = vand.u32 4294901760, %v9476_v52  ;;  %v10115_v29 = vand.u32 4294901760, %v9478_v51  ;;  %v10120_v52 = vand.u32 4294901760, %v9516_v62 }
 0x6f8   :  { %8124 = vmatprep.subr.bf16.mxu0 %v9558_v2  ;;  %v10121_v51 = vand.u32 4294901760, %v9518_v13  ;;  %v5729_v62 = vand.u32 4294901760, %v5683_v42  ;;  %v5684_v13 = vld [vmem:[#allocation9 + $0x60] sm:$0xff] }
 0x6f9   :  { %v8187_v19 = vpack.c.bf16 %v10115_v29, %v10114_v20 }
 0x6fa   :  { %8250 = vmatpush3.bf16.msra.mxu1 %v9691_v10 }
 0x6fb   :  { %8126 = vmatpush3.bf16.msra.mxu0 %v9558_v2  ;;  %8252 = vmatprep.subr.bf16.mxu1 %v9703_v50  ;;  %v8179_v2 = vpack.c.bf16 %v5109_v61, %v5102_v46  ;;  %v9803_v61 = vsub.f32 %v9647_v22, %v5696_v21 }
 0x6fc   :  { %8128 = vmatprep.subr.bf16.mxu0 %v9562_v48 }
 0x6fe   :  { %8254 = vmatpush3.bf16.msra.mxu1 %v9703_v50 }
 0x6ff   :  { %8130 = vmatpush3.bf16.msra.mxu0 %v9562_v48  ;;  %v10116_v48 = vand.u32 4294901760, %v9490_v31  ;;  %v10122_v31 = vand.u32 4294901760, %v9532_v60  ;;  %v5732_v60 = vand.u32 4294901760, %v5684_v13 }
 0x700   :  { %8132 = vmatprep.subr.bf16.mxu0 %v9566_v28 }
 0x703   :  { %8134 = vmatpush3.bf16.msra.mxu0 %v9566_v28  ;;  %v10117_v28 = vand.u32 4294901760, %v9492_v34  ;;  %v10123_v34 = vand.u32 4294901760, %v9534_v44 }
 0x704   :  { %8136 = vmatprep.subr.bf16.mxu0 %v9570_v59 }
 0x705   :  { %v8203_v36 = vpack.c.bf16 %v10123_v34, %v10122_v31  ;;  %v9853_v34 = vsub.f32 %v5684_v13, %v5732_v60 }
 0x707   :  { %8138 = vmatpush3.bf16.msra.mxu0 %v9570_v59  ;;  %v8191_v59 = vpack.c.bf16 %v10117_v28, %v10116_v48 }
 0x708   :  { %8140 = vmatprep.subr.bf16.mxu0 %v9574_v7 }
 0x70b   :  { %8142 = vmatpush3.bf16.msra.mxu0 %v9574_v7  ;;  %v8199_v7 = vpack.c.bf16 %v10121_v51, %v10120_v52 }
 0x70c   :  { %8144 = vmatprep.subr.bf16.mxu0 %v9408_v49 }
 0x70e   :  { %7466 = vmatmul.mubr.f32.vlgmr.msra.gmra.mrb[10].mxu0 %v9609_v0  ;;  %v5687_v0 = vld [vmem:[#allocation9 + $0x78] sm:$0xff] }
 0x70f   :  { %8146 = vmatpush3.bf16.msra.mxu0 %v9408_v49  ;;  %7500 = vmatprep.mubr.f32.mxu0 %v5067_v39  ;;  %v5799_v39 = vand.u32 4294901760, %v9803_v61 }
 0x710   :  { %8148 = vmatprep.subr.bf16.mxu0 %v9419_v30 }
 0x711   :  { %v5800_v22 = vsub.f32 %v9803_v61, %v5799_v39 }
 0x713   :  { %8150 = vmatpush3.bf16.msra.mxu0 %v9419_v30  ;;  %v5801_v21 = vand.u32 4294901760, %v5800_v22 }
 0x714   :  { %8152 = vmatprep.subr.bf16.mxu0 %v9425_v16 }
 0x717   :  { %8154 = vmatpush3.bf16.msra.mxu0 %v9425_v16 }
 0x718   :  { %8156 = vmatprep.subr.bf16.mxu0 %v9429_v11 }
 0x71b   :  { %8158 = vmatpush3.bf16.msra.mxu0 %v9429_v11 }
 0x71c   :  { %8160 = vmatprep.subr.bf16.mxu0 %v9433_v32 }
 0x71f   :  { %8162 = vmatpush3.bf16.msra.mxu0 %v9433_v32 }
 0x720   :  { %8164 = vmatprep.subr.bf16.mxu0 %v9437_v40 }
 0x723   :  { %8166 = vmatpush3.bf16.msra.mxu0 %v9437_v40 }
 0x724   :  { %8168 = vmatprep.subr.bf16.mxu0 %v9441_v1 }
 0x727   :  { %8170 = vmatpush3.bf16.msra.mxu0 %v9441_v1 }
 0x728   :  { %8172 = vmatprep.subr.bf16.mxu0 %v9451_v33 }
 0x72b   :  { %8174 = vmatpush3.bf16.msra.mxu0 %v9451_v33 }
 0x72c   :  { %8176 = vmatprep.subr.bf16.mxu0 %v8175_v35 }
 0x72e   :  { %7501 = vmatmul.mubr.f32.vlgmr.msra.gmra.mrb[10].mxu0 %v5077_v55  ;;  %v5741_v55 = vand.u32 4294901760, %v5687_v0 }
 0x72f   :  { %8178 = vmatpush3.bf16.msra.mxu0 %v8175_v35  ;;  %7535 = vmatprep.mubr.f32.mxu0 %v9605_v23 }
 0x730   :  { %8180 = vmatprep.subr.bf16.mxu0 %v8179_v2 }
 0x733   :  { %8182 = vmatpush3.bf16.msra.mxu0 %v8179_v2 }
 0x734   :  { %8184 = vmatprep.subr.bf16.mxu0 %v8183_v12 }
 0x737   :  { %8186 = vmatpush3.bf16.msra.mxu0 %v8183_v12 }
 0x738   :  { %8188 = vmatprep.subr.bf16.mxu0 %v8187_v19 }
 0x73b   :  { %8190 = vmatpush3.bf16.msra.mxu0 %v8187_v19 }
 0x73c   :  { %8192 = vmatprep.subr.bf16.mxu0 %v8191_v59 }
 0x73f   :  { %8194 = vmatpush3.bf16.msra.mxu0 %v8191_v59  ;;  %v9841_v59 = vsub.f32 %v5683_v42, %v5729_v62 }
 0x740   :  { %8196 = vmatprep.subr.bf16.mxu0 %v8195_v38 }
 0x741   :  { %v10110_v52 = vand.u32 4294901760, %v9841_v59 }
 0x743   :  { %8198 = vmatpush3.bf16.msra.mxu0 %v8195_v38  ;;  %v5877_v31 = vsub.f32 %v9841_v59, %v10110_v52 }
 0x744   :  { %8200 = vmatprep.subr.bf16.mxu0 %v8199_v7 }
 0x747   :  { %8202 = vmatpush3.bf16.msra.mxu0 %v8199_v7 }
 0x748   :  { %8204 = vmatprep.subr.bf16.mxu0 %v8203_v36 }
 0x74b   :  { %8206 = vmatpush3.bf16.msra.mxu0 %v8203_v36 }
 0x74c   :  { %8208 = vmatprep.subr.bf16.mxu0 %v9408_v49 }
 0x74e   :  { %7536 = vmatmul.mubr.f32.vlgmr.msra.gmra.mrb[10].mxu0 %v9602_v4 }
 0x74f   :  { %8210 = vmatpush3.bf16.msra.mxu0 %v9408_v49  ;;  %7570 = vmatprep.mubr.f32.mxu0 %v9605_v23  ;;  %v5680_v49 = vld [vmem:[#allocation9 + $0x40] sm:$0xff]  ;;  %v5686_v23 = vld [vmem:[#allocation9 + $0x70] sm:$0xff] }
 0x750   :  { %8212 = vmatprep.subr.bf16.mxu0 %v9419_v30  ;;  %v5738_v54 = vand.u32 4294901760, %v5686_v23 }
 0x752   :  { %v9814_v35 = vpack.c.bf16 %v5741_v55, %v5738_v54 }
 0x753   :  { %8214 = vmatpush3.bf16.msra.mxu0 %v9419_v30  ;;  %v5681_v30 = vld [vmem:[#allocation9 + $0x48] sm:$0xff] }
 0x754   :  { %8216 = vmatprep.subr.bf16.mxu0 %v9425_v16 }
 0x757   :  { %8218 = vmatpush3.bf16.msra.mxu0 %v9425_v16  ;;  %v5720_v16 = vand.u32 4294901760, %v5680_v49 }
 0x758   :  { %8220 = vmatprep.subr.bf16.mxu0 %v9429_v11 }
 0x759   :  { %v9827_v47 = vsub.f32 %v5680_v49, %v5720_v16 }
 0x75b   :  { %8222 = vmatpush3.bf16.msra.mxu0 %v9429_v11  ;;  %v5723_v11 = vand.u32 4294901760, %v5681_v30  ;;  %v5855_v20 = vand.u32 4294901760, %v9827_v47 }
 0x75c   :  { %8224 = vmatprep.subr.bf16.mxu0 %v9433_v32 }
 0x75d   :  { %v9790_v8 = vpack.c.bf16 %v5723_v11, %v5720_v16  ;;  %v9829_v12 = vsub.f32 %v5681_v30, %v5723_v11  ;;  %v5856_v19 = vsub.f32 %v9827_v47, %v5855_v20  ;;  %v5878_v30 = vand.u32 4294901760, %v5877_v31 }
 0x75e   :  { %v10109_v16 = vand.u32 4294901760, %v9853_v34 }
 0x75f   :  { %8226 = vmatpush3.bf16.msra.mxu0 %v9433_v32  ;;  %v5682_v32 = vld [vmem:[#allocation9 + $0x50] sm:$0xff]  ;;  %8256 = vmatprep.subr.bf16.mxu1 %v9790_v8  ;;  %v10112_v29 = vand.u32 4294901760, %v9829_v12  ;;  %v5857_v3 = vand.u32 4294901760, %v5856_v19  ;;  %v9889_v19 = vpack.c.bf16 %v9829_v12, %v9827_v47 }
 0x760   :  { %8228 = vmatprep.subr.bf16.mxu0 %v9437_v40  ;;  %8258 = vmatpush3.bf16.msra.mxu1 %v9790_v8  ;;  %v5884_v42 = vsub.f32 %v9853_v34, %v10109_v16 }
 0x761   :  { %v5863_v48 = vsub.f32 %v9829_v12, %v10112_v29 }
 0x763   :  { %8230 = vmatpush3.bf16.msra.mxu0 %v9437_v40  ;;  %v5726_v40 = vand.u32 4294901760, %v5682_v32  ;;  %v5864_v37 = vand.u32 4294901760, %v5863_v48 }
 0x764   :  { %8232 = vmatprep.subr.bf16.mxu0 %v9441_v1 }
 0x765   :  { %v9839_v28 = vsub.f32 %v5682_v32, %v5726_v40  ;;  %v9845_v51 = vpack.c.bf16 %v5864_v37, %v5857_v3 }
 0x767   :  { %8234 = vmatpush3.bf16.msra.mxu0 %v9441_v1  ;;  %v9794_v1 = vpack.c.bf16 %v5729_v62, %v5726_v40  ;;  %v10111_v38 = vand.u32 4294901760, %v9839_v28  ;;  %v9864_v40 = vsub.f32 %v5686_v23, %v5738_v54  ;;  %v9866_v62 = vsub.f32 %v5687_v0, %v5741_v55 }
 0x768   :  { %8236 = vmatprep.subr.bf16.mxu0 %v9451_v33  ;;  %v9893_v48 = vpack.c.bf16 %v9841_v59, %v9839_v28 }
 0x769   :  { %8260 = vmatprep.subr.bf16.mxu1 %v9794_v1  ;;  %v5870_v7 = vsub.f32 %v9839_v28, %v10111_v38  ;;  %v9901_v37 = vpack.c.bf16 %v9866_v62, %v9864_v40  ;;  %v10129_v47 = vand.u32 4294901760, %v9864_v40 }
 0x76a   :  { %8262 = vmatpush3.bf16.msra.mxu1 %v9794_v1 }
 0x76b   :  { %8238 = vmatpush3.bf16.msra.mxu0 %v9451_v33  ;;  %v5685_v33 = vld [vmem:[#allocation9 + $0x68] sm:$0xff]  ;;  %v5871_v49 = vand.u32 4294901760, %v5870_v7  ;;  %v6395_v7 = vld [vmem:[%s10091_s5] ss:$0 sm:$0xff] }
 0x76c   :  { %v5735_v44 = vand.u32 4294901760, %v5685_v33 }
 0x76d   :  { %v9859_v32 = vpack.c.bf16 %v5878_v30, %v5871_v49  ;;  %v9909_v49 = vsub.f32 %v9651_v17, %v5702_v27  ;;  %v9914_v30 = vsub.f32 %v9657_v26, %v5705_v58  ;;  %v9926_v26 = vsub.f32 %v9662_v18, %v5711_v56 }
 0x76e   :  { %7571 = vmatmul.mubr.f32.vlgmr.msra.gmra.mrb[10].mxu0 %v9602_v4  ;;  %v9798_v46 = vpack.c.bf16 %v5735_v44, %v5732_v60  ;;  %v9808_v4 = vsub.f32 %v9649_v6, %v5699_v43  ;;  %v9855_v36 = vsub.f32 %v5685_v33, %v5735_v44  ;;  %v5885_v33 = vand.u32 4294901760, %v5884_v42 }
 0x76f   :  { %v10107_v60 = vand.u32 4294901760, %v9864_v40  ;;  %v10106_v44 = vand.u32 4294901760, %v9866_v62  ;;  %v5834_v18 = vand.u32 4294901760, %v9926_v26  ;;  %v9946_v56 = vsub.f32 %v9679_v41, %v5714_v57 }
 0x770   :  { %8264 = vmatprep.subr.bf16.mxu1 %v9798_v46  ;;  %v5806_v45 = vand.u32 4294901760, %v9808_v4  ;;  %v10108_v11 = vand.u32 4294901760, %v9855_v36  ;;  %v9897_v3 = vpack.c.bf16 %v9855_v36, %v9853_v34 }
 0x771   :  { %8266 = vmatpush3.bf16.msra.mxu1 %v9798_v46  ;;  %v5905_v23 = vsub.f32 %v9866_v62, %v10106_v44  ;;  %v5841_v57 = vand.u32 4294901760, %v9946_v56 }
 0x772   :  { %v5807_v6 = vsub.f32 %v9808_v4, %v5806_v45  ;;  %8268 = vmatprep.subr.bf16.mxu1 %v9814_v35  ;;  %v5891_v13 = vsub.f32 %v9855_v36, %v10108_v11 }
 0x773   :  { %v5906_v55 = vand.u32 4294901760, %v5905_v23  ;;  %v5813_v23 = vand.u32 4294901760, %v9909_v49  ;;  %v5842_v38 = vsub.f32 %v9946_v56, %v5841_v57 }
 0x774   :  { %v5808_v43 = vand.u32 4294901760, %v5807_v6  ;;  %v5892_v22 = vand.u32 4294901760, %v5891_v13  ;;  %v5898_v6 = vsub.f32 %v9864_v40, %v10107_v60 }
 0x775   :  { %8270 = vmatpush3.bf16.msra.mxu1 %v9814_v35 }
 0x776   :  { %v9824_v2 = vpack.c.bf16 %v5808_v43, %v5801_v21  ;;  %v9879_v0 = vpack.c.bf16 %v5892_v22, %v5885_v33  ;;  %v5899_v54 = vand.u32 4294901760, %v5898_v6  ;;  %v9885_v43 = vpack.c.bf16 %v9808_v4, %v9803_v61 }
 0x778   :  { %8272 = vmatprep.subr.bf16.mxu1 %v9824_v2  ;;  %v9881_v21 = vpack.c.bf16 %v5906_v55, %v5899_v54  ;;  %v5820_v54 = vand.u32 4294901760, %v9914_v30  ;;  %v9921_v55 = vsub.f32 %v9660_v9, %v5708_v53 }
 0x77a   :  { %v5821_v9 = vsub.f32 %v9914_v30, %v5820_v54  ;;  %v5827_v53 = vand.u32 4294901760, %v9921_v55 }
 0x77c   :  { %v5822_v44 = vand.u32 4294901760, %v5821_v9  ;;  %v5828_v60 = vsub.f32 %v9921_v55, %v5827_v53  ;;  %v8375_v61 = vpack.c.bf16 %v5834_v18, %v5827_v53 }
 0x77e   :  { %v5829_v11 = vand.u32 4294901760, %v5828_v60 }
 0x841   :  { %v7572_v31 = vpop.f32.mrb[10].mxu0 }
 0x842   :  { %v8435_v42 = vadd.f32 %v7572_v31, %v6395_v7  ;;  %v5658_v13 = vpop.f32.mrb[11].mxu0  ;;  %v5814_v31 = vsub.f32 %v9909_v49, %v5813_v23 }
 0x843   :  { %v8436_v33 = vadd.f32 %v6395_v7, %v5658_v13  ;;  %v9951_v13 = vsub.f32 %v9681_v14, %v5717_v15  ;;  %v5835_v14 = vsub.f32 %v9926_v26, %v5834_v18 }
 0x844   :  { %v5669_v22 = vmul.f32 0.01, %v8435_v42 }
 0x845   :  { %v5668_v6 = vmul.f32 0.01, %v8436_v33  ;;  %v5848_v15 = vand.u32 4294901760, %v9951_v13  ;;  %v5836_v52 = vand.u32 4294901760, %v5835_v14 }
 0x846   :  { %v5671_v17 = vmax.f32 %v8435_v42, %v5669_v22 }
 0x847   :  { %v5670_v27 = vmax.f32 %v8436_v33, %v5668_v6  ;;  %v5849_v29 = vsub.f32 %v9951_v13, %v5848_v15  ;;  %v8379_v4 = vpack.c.bf16 %v5848_v15, %v5841_v57 }
 0x848   :  { %v9928_v58 = vand.u32 4294901760, %v5671_v17 }
 0x849   :  { %v9930_v7 = vand.u32 4294901760, %v5670_v27  ;;  %v5850_v60 = vand.u32 4294901760, %v5849_v29  ;;  %v8311_v29 = vpack.c.bf16 %v9926_v26, %v9921_v55 }
 0x84a   :  { %v9940_v42 = vsub.f32 %v5671_v17, %v9928_v58  ;;  %v5815_v17 = vand.u32 4294901760, %v5814_v31 }
 0x84b   :  { %v9954_v33 = vsub.f32 %v5670_v27, %v9930_v7 }
 0x84c   :  { %v5788_v22 = vand.u32 4294901760, %v9940_v42  ;;  %v8275_v9 = vpack.c.bf16 %v5822_v44, %v5815_v17  ;;  %v5843_v44 = vand.u32 4294901760, %v5842_v38  ;;  %v8315_v38 = vpack.c.bf16 %v9951_v13, %v9946_v56 }
 0x84d   :  { %v5778_v6 = vand.u32 4294901760, %v9954_v33 }
 0x84e   :  { %v5789_v41 = vsub.f32 %v9940_v42, %v5788_v22  ;;  %v8283_v17 = vpack.c.bf16 %v5850_v60, %v5843_v44 }
 0x84f   :  { %v5779_v27 = vsub.f32 %v9954_v33, %v5778_v6 }
 0x850   :  { %v5790_v16 = vand.u32 4294901760, %v5789_v41 }
 0x851   :  { %v5780_v31 = vand.u32 4294901760, %v5779_v27  ;;  %v8279_v27 = vpack.c.bf16 %v5836_v52, %v5829_v11  ;;  %v8367_v52 = vpack.c.bf16 %v5806_v45, %v5799_v39  ;;  %v10124_v39 = vand.u32 4294901760, %v9829_v12 }
 0x852   :  { %v10126_v11 = vand.u32 4294901760, %v9841_v59  ;;  %v10130_v12 = vand.u32 4294901760, %v9866_v62 }
 0x853   :  { %7605 = vmatprep.mubr.f32.mxu1 %v5780_v31  ;;  %v8383_v45 = vpack.c.bf16 %v10124_v39, %v5855_v20 }
 0x854   :  { %7606 = vmatmul.mubr.f32.vlgmr.msra.gmra.mrb[10].mxu1 %v5790_v16  ;;  %v10125_v16 = vand.u32 4294901760, %v9839_v28  ;;  %v8395_v20 = vpack.c.bf16 %v10130_v12, %v10129_v47 }
 0x855   :  { %8274 = vmatpush3.bf16.msra.mxu1 %v9824_v2  ;;  %7640 = vmatprep.mubr.f32.mxu1 %v9930_v7  ;;  %v8307_v2 = vpack.c.bf16 %v9914_v30, %v9909_v49 }
 0x856   :  { %8276 = vmatprep.subr.bf16.mxu1 %v8275_v9 }
 0x859   :  { %8278 = vmatpush3.bf16.msra.mxu1 %v8275_v9 }
 0x85a   :  { %8280 = vmatprep.subr.bf16.mxu1 %v8279_v27 }
 0x85d   :  { %8282 = vmatpush3.bf16.msra.mxu1 %v8279_v27 }
 0x85e   :  { %8284 = vmatprep.subr.bf16.mxu1 %v8283_v17 }
 0x861   :  { %8286 = vmatpush3.bf16.msra.mxu1 %v8283_v17 }
 0x862   :  { %8288 = vmatprep.subr.bf16.mxu1 %v9845_v51 }
 0x865   :  { %8290 = vmatpush3.bf16.msra.mxu1 %v9845_v51  ;;  %v8371_v51 = vpack.c.bf16 %v5820_v54, %v5813_v23 }
 0x866   :  { %8292 = vmatprep.subr.bf16.mxu1 %v9859_v32 }
 0x869   :  { %8294 = vmatpush3.bf16.msra.mxu1 %v9859_v32  ;;  %v8387_v32 = vpack.c.bf16 %v10126_v11, %v10125_v16 }
 0x86a   :  { %8296 = vmatprep.subr.bf16.mxu1 %v9879_v0 }
 0x86d   :  { %8298 = vmatpush3.bf16.msra.mxu1 %v9879_v0  ;;  %v10127_v0 = vand.u32 4294901760, %v9853_v34 }
 0x86e   :  { %8300 = vmatprep.subr.bf16.mxu1 %v9881_v21 }
 0x871   :  { %8302 = vmatpush3.bf16.msra.mxu1 %v9881_v21  ;;  %v10128_v21 = vand.u32 4294901760, %v9855_v36 }
 0x872   :  { %8304 = vmatprep.subr.bf16.mxu1 %v9885_v43 }
 0x874   :  { %7641 = vmatmul.mubr.f32.vlgmr.msra.gmra.mrb[10].mxu1 %v9928_v58 }
 0x875   :  { %8306 = vmatpush3.bf16.msra.mxu1 %v9885_v43  ;;  %7675 = vmatprep.mubr.f32.mxu1 %v9954_v33  ;;  %v8391_v43 = vpack.c.bf16 %v10128_v21, %v10127_v0 }
 0x876   :  { %8308 = vmatprep.subr.bf16.mxu1 %v8307_v2 }
 0x879   :  { %8310 = vmatpush3.bf16.msra.mxu1 %v8307_v2 }
 0x87a   :  { %8312 = vmatprep.subr.bf16.mxu1 %v8311_v29 }
 0x87d   :  { %8314 = vmatpush3.bf16.msra.mxu1 %v8311_v29 }
 0x87e   :  { %8316 = vmatprep.subr.bf16.mxu1 %v8315_v38 }
 0x881   :  { %8318 = vmatpush3.bf16.msra.mxu1 %v8315_v38 }
 0x882   :  { %8320 = vmatprep.subr.bf16.mxu1 %v9889_v19 }
 0x885   :  { %8322 = vmatpush3.bf16.msra.mxu1 %v9889_v19 }
 0x886   :  { %8324 = vmatprep.subr.bf16.mxu1 %v9893_v48 }
 0x889   :  { %8326 = vmatpush3.bf16.msra.mxu1 %v9893_v48 }
 0x88a   :  { %8328 = vmatprep.subr.bf16.mxu1 %v9897_v3 }
 0x88d   :  { %8330 = vmatpush3.bf16.msra.mxu1 %v9897_v3 }
 0x88e   :  { %8332 = vmatprep.subr.bf16.mxu1 %v9901_v37 }
 0x891   :  { %8334 = vmatpush3.bf16.msra.mxu1 %v9901_v37 }
 0x892   :  { %8336 = vmatprep.subr.bf16.mxu1 %v9669_v5 }
 0x894   :  { %7676 = vmatmul.mubr.f32.vlgmr.msra.gmra.mrb[10].mxu1 %v9940_v42 }
 0x895   :  { %8338 = vmatpush3.bf16.msra.mxu1 %v9669_v5  ;;  %7710 = vmatprep.mubr.f32.mxu1 %v5778_v6 }
 0x896   :  { %8340 = vmatprep.subr.bf16.mxu1 %v9677_v24 }
 0x899   :  { %8342 = vmatpush3.bf16.msra.mxu1 %v9677_v24 }
 0x89a   :  { %8344 = vmatprep.subr.bf16.mxu1 %v9691_v10 }
 0x89d   :  { %8346 = vmatpush3.bf16.msra.mxu1 %v9691_v10 }
 0x89e   :  { %8348 = vmatprep.subr.bf16.mxu1 %v9703_v50 }
 0x8a1   :  { %8350 = vmatpush3.bf16.msra.mxu1 %v9703_v50 }
 0x8a2   :  { %8352 = vmatprep.subr.bf16.mxu1 %v9790_v8 }
 0x8a5   :  { %8354 = vmatpush3.bf16.msra.mxu1 %v9790_v8 }
 0x8a6   :  { %8356 = vmatprep.subr.bf16.mxu1 %v9794_v1 }
 0x8a9   :  { %8358 = vmatpush3.bf16.msra.mxu1 %v9794_v1 }
 0x8aa   :  { %8360 = vmatprep.subr.bf16.mxu1 %v9798_v46 }
 0x8ad   :  { %8362 = vmatpush3.bf16.msra.mxu1 %v9798_v46 }
 0x8ae   :  { %8364 = vmatprep.subr.bf16.mxu1 %v9814_v35 }
 0x8b1   :  { %8366 = vmatpush3.bf16.msra.mxu1 %v9814_v35 }
 0x8b2   :  { %8368 = vmatprep.subr.bf16.mxu1 %v8367_v52 }
 0x8b4   :  { %7711 = vmatmul.mubr.f32.vlgmr.msra.gmra.mrb[10].mxu1 %v5788_v22 }
 0x8b5   :  { %8370 = vmatpush3.bf16.msra.mxu1 %v8367_v52  ;;  %7745 = vmatprep.mubr.f32.mxu1 %v9930_v7 }
 0x8b6   :  { %8372 = vmatprep.subr.bf16.mxu1 %v8371_v51 }
 0x8b9   :  { %8374 = vmatpush3.bf16.msra.mxu1 %v8371_v51 }
 0x8ba   :  { %8376 = vmatprep.subr.bf16.mxu1 %v8375_v61 }
 0x8bd   :  { %8378 = vmatpush3.bf16.msra.mxu1 %v8375_v61 }
 0x8be   :  { %8380 = vmatprep.subr.bf16.mxu1 %v8379_v4 }
 0x8c1   :  { %8382 = vmatpush3.bf16.msra.mxu1 %v8379_v4 }
 0x8c2   :  { %8384 = vmatprep.subr.bf16.mxu1 %v8383_v45 }
 0x8c5   :  { %8386 = vmatpush3.bf16.msra.mxu1 %v8383_v45 }
 0x8c6   :  { %8388 = vmatprep.subr.bf16.mxu1 %v8387_v32 }
 0x8c9   :  { %8390 = vmatpush3.bf16.msra.mxu1 %v8387_v32 }
 0x8ca   :  { %8392 = vmatprep.subr.bf16.mxu1 %v8391_v43 }
 0x8cd   :  { %8394 = vmatpush3.bf16.msra.mxu1 %v8391_v43 }
 0x8ce   :  { %8396 = vmatprep.subr.bf16.mxu1 %v8395_v20 }
 0x8d1   :  { %8398 = vmatpush3.bf16.msra.mxu1 %v8395_v20 }
 0x8d2   :  { %8400 = vmatprep.subr.bf16.mxu1 %v9669_v5 }
 0x8d4   :  { %7746 = vmatmul.mubr.f32.vlgmr.msra.gmra.mrb[10].mxu1 %v9928_v58 }
 0x8d5   :  { %8402 = vmatpush3.bf16.msra.mxu1 %v9669_v5  ;;  %7780 = vmatprep.mubr.f32.mxu1 %v9930_v7  ;;  %v6396_v5 = vld [vmem:[%s10093_s7] ss:$0 sm:$0xff] }
 0x8d6   :  { %8404 = vmatprep.subr.bf16.mxu1 %v9677_v24 }
 0x8d9   :  { %8406 = vmatpush3.bf16.msra.mxu1 %v9677_v24 }
 0x8da   :  { %8408 = vmatprep.subr.bf16.mxu1 %v9691_v10 }
 0x8dd   :  { %8410 = vmatpush3.bf16.msra.mxu1 %v9691_v10 }
 0x8de   :  { %8412 = vmatprep.subr.bf16.mxu1 %v9703_v50 }
 0x8e1   :  { %8414 = vmatpush3.bf16.msra.mxu1 %v9703_v50 }
 0x8e2   :  { %8416 = vmatprep.subr.bf16.mxu1 %v9790_v8 }
 0x8e5   :  { %8418 = vmatpush3.bf16.msra.mxu1 %v9790_v8 }
 0x8e6   :  { %8420 = vmatprep.subr.bf16.mxu1 %v9794_v1 }
 0x8e9   :  { %8422 = vmatpush3.bf16.msra.mxu1 %v9794_v1 }
 0x8ea   :  { %8424 = vmatprep.subr.bf16.mxu1 %v9798_v46 }
 0x8ed   :  { %8426 = vmatpush3.bf16.msra.mxu1 %v9798_v46 }
 0x8ee   :  { %8428 = vmatprep.subr.bf16.mxu1 %v9814_v35 }
 0x8f1   :  { %8430 = vmatpush3.bf16.msra.mxu1 %v9814_v35 }
 0x8f4   :  { %7781 = vmatmul.mubr.f32.vlgmr.msra.gmra.mrb[10].mxu1 %v9928_v58 }
 0x9c7   :  { %v7782_v24 = vpop.f32.mrb[10].mxu1 }
 0x9c8   :  { %v8437_v10 = vadd.f32 %v7782_v24, %v6396_v5  ;;  %v6369_v50 = vpop.f32.mrb[11].mxu1 }
 0x9c9   :  { %v8438_v8 = vadd.f32 %v6396_v5, %v6369_v50 }
 0x9ca   :  { %v6380_v28 = vmul.f32 0.01, %v8437_v10 }
 0x9cb   :  { %v6379_v1 = vmul.f32 0.01, %v8438_v8 }
 0x9cc   :  { %v6382_v59 = vmax.f32 %v8437_v10, %v6380_v28 }
 0x9cd   :  { %v6381_v34 = vmax.f32 %v8438_v8, %v6379_v1 }
 0x9ce   :  { %v6384_v46 = vadd.f32 %v6382_v59, %v9594_v25 }
 0x9cf   :  { %v6383_v36 = vadd.f32 %v6381_v34, %v9599_v63 }
 0x9d0   :  { %6386 = vst [vmem:[%s10094_s8 + $0x8] sm:$0xff] %v6384_v46 }
 0x9d1   :  { %6385 = vst [vmem:[%s10094_s8] sm:$0xff] %v6383_v36 }
 0x9d2   :  { %6391 = vsyncpa [#allocation3], 1 }
 0x9d3   :  { %6392 = vsyncpa [#allocation5], 1 }
 0x9d4   :  { %6393 = vsyncpa [#allocation8], 1 }

</bundles_post_ra>
